<compile_context>
chip_gen: v7x
topology: tpu7x:2x2x1
jax: 0.10.0
libtpu: 0.0.40
codegen_flags: <defaults>
</compile_context>

<pallas_src>
import functools

import jax
import jax.numpy as jnp
from jax import lax
from jax.experimental import pallas as pl
from jax.experimental.pallas import tpu as pltpu


def _round_up(x, m):
    return ((x + m - 1) // m) * m


def _device_kind():
    try:
        return jax.devices()[0].device_kind.lower()
    except Exception:
        return ""


def _lstm_hybrid_kernel(x_ref, w_ih_ref, w_hh_ref, b_ref, fc_w_ref, fc_b_ref,
                        out_ref, seq_ref, gx_ref, dma_sem,
                        *, hidden_pad, feat_pad, seq_len, batch_tile,
                        chunk_len, use_bf16_act):
    Hp, P, T, Bt, Tc = hidden_pad, feat_pad, seq_len, batch_tile, chunk_len
    btile = pl.program_id(0)
    layer = pl.program_id(1)
    num_layers = pl.num_programs(1)
    n_chunks = (T + Tc - 1) // Tc
    chunk_bounds = [(k * Tc, min(Tc, T - k * Tc)) for k in range(n_chunks)]

    def x_copy(k):
        c0, cl = chunk_bounds[k]
        return pltpu.make_async_copy(
            x_ref.at[btile, pl.ds(c0, cl)],      # (cl, Bt, P) HBM slice
            seq_ref.at[pl.ds(c0, cl)],           # (cl, Bt, P) VMEM
            dma_sem.at[k])

    # Layer 0 of each batch tile: start all per-chunk HBM->VMEM copies of the
    # (time-major, padded, bf16) input up front; each chunk is waited on right
    # before its hoisted input-projection GEMM so the transfer overlaps with
    # the weight loads and earlier chunks' compute.
    @pl.when(layer == 0)
    def _():
        for k in range(n_chunks):
            x_copy(k).start()

    w_ih = w_ih_ref[...]     # (P, 4Hp)  bf16, pre-transposed, zero-padded rows
    w_hh = w_hh_ref[...]     # (Hp, 4Hp) bf16, pre-transposed
    bias = b_ref[...]        # (1, 4Hp)  f32, b_ih + b_hh (zero in padded lanes)

    def compute_gx_chunk(k):
        """Hoisted input projection for timestep chunk k into gx_ref[k % 2]."""
        c0, cl = chunk_bounds[k]

        @pl.when(layer == 0)
        def _():
            x_copy(k).wait()

        xc = seq_ref[pl.ds(c0, cl)].reshape(cl * Bt, P)              # bf16
        g = jnp.dot(xc, w_ih, preferred_element_type=jnp.float32) + bias
        gx_ref[k % 2, 0:cl] = g.astype(gx_ref.dtype).reshape(cl, Bt, 4 * Hp)

    # PyTorch default: zero initial (h, c) for every layer.  Carried as loop
    # values (vregs), not VMEM refs.
    h = jnp.zeros((Bt, Hp), jnp.bfloat16)
    c = jnp.zeros((Bt, Hp), jnp.float32)

    compute_gx_chunk(0)                           # prologue: chunk 0 projection

    for k in range(n_chunks):
        # Issue chunk k+1's big MXU GEMM before chunk k's serial recurrence;
        # the double-buffered gx scratch removes the WAR hazard so the
        # scheduler can hide the GEMM under the latency-bound time loop.
        if k + 1 < n_chunks:
            compute_gx_chunk(k + 1)

        c0, cl = chunk_bounds[k]
        slot = k % 2

        def step(t, carry, c0=c0, slot=slot):
            h, c = carry                                    # bf16 / f32 (Bt, Hp)
            gates = (jnp.dot(h, w_hh, preferred_element_type=jnp.float32)
                     + gx_ref[slot, t])                     # f32 (Bt, 4Hp)
            if use_bf16_act:                                # bf16 EUP (v6e/v7x)
                gates = gates.astype(jnp.bfloat16)
            # Gate order rearranged at param-prep time to (i, f, o, g) so the
            # three sigmoids form one contiguous EUP stream.
            sg = jax.nn.sigmoid(gates[:, 0:3 * Hp])
            i_g = sg[:, 0 * Hp:1 * Hp].astype(jnp.float32)
            f_g = sg[:, 1 * Hp:2 * Hp].astype(jnp.float32)
            o_g = sg[:, 2 * Hp:3 * Hp].astype(jnp.float32)
            g_g = jnp.tanh(gates[:, 3 * Hp:4 * Hp]).astype(jnp.float32)
            c_new = f_g * c + i_g * g_g                     # f32 accumulation
            tc_in = c_new.astype(jnp.bfloat16) if use_bf16_act else c_new
            h_new = (o_g * jnp.tanh(tc_in).astype(jnp.float32)).astype(jnp.bfloat16)
            # This layer's output is the next layer's input.
            if P > Hp:
                seq_ref[c0 + t, :, 0:Hp] = h_new
            else:
                seq_ref[c0 + t] = h_new
            return h_new, c_new

        # Bounded unroll: enough cross-step overlap without exploding vreg
        # live ranges / compile time for long sequences.
        h, c = lax.fori_loop(0, cl, step, (h, c), unroll=min(cl, 8))

    # Final layer: fc(out[:, -1, :]) = h_T @ W_fc^T + b_fc, straight from the
    # carried h (no VMEM round-trip needed).
    @pl.when(layer == num_layers - 1)
    def _():
        out_ref[...] = (jnp.dot(h.astype(jnp.float32), fc_w_ref[...],
                                preferred_element_type=jnp.float32)
                        + fc_b_ref[...])


def make_params(key, input_dim, hidden_dim, num_layers, output_dim):
    """Deterministic synthetic parameters with PyTorch nn.LSTM / nn.Linear shapes."""
    H = hidden_dim
    params = {"w_ih": [], "w_hh": [], "b_ih": [], "b_hh": []}
    for l in range(num_layers):
        in_l = input_dim if l == 0 else hidden_dim
        key, k1, k2, k3, k4 = jax.random.split(key, 5)
        params["w_ih"].append(0.1 * jax.random.normal(k1, (4 * H, in_l), jnp.float32))
        params["w_hh"].append(0.1 * jax.random.normal(k2, (4 * H, H), jnp.float32))
        params["b_ih"].append(0.1 * jax.random.normal(k3, (4 * H,), jnp.float32))
        params["b_hh"].append(0.1 * jax.random.normal(k4, (4 * H,), jnp.float32))
    key, k5, k6 = jax.random.split(key, 3)
    params["fc_w"] = 0.1 * jax.random.normal(k5, (output_dim, H), jnp.float32)
    params["fc_b"] = 0.1 * jax.random.normal(k6, (output_dim,), jnp.float32)
    return params


def lstm_hybrid_forward(t, y, params, *, hidden_dim, num_layers, output_dim):
    """Pallas implementation of LSTMHybrid.forward(t, y).  `t` is unused (as in PyTorch)."""
    del t
    if y.ndim == 2:
        y = y[:, None, :]                        # unsqueeze(1)
    B, T, D = y.shape
    H, L, O = hidden_dim, num_layers, output_dim

    kind = _device_kind()
    is_v7 = "v7" in kind
    use_bf16_act = ("v6" in kind) or ("v7" in kind)   # v5e keeps f32 EUP math

    Hp = _round_up(H, 128)                       # lane-aligned gate width
    P = max(_round_up(D, 128), Hp)               # sequence feature width

    # Batch tiling: one tile per TensorCore on v7x (megacore batch parallelism),
    # otherwise a single tile (extra tiles would just repeat the layer loop).
    n_btiles = 2 if (is_v7 and B > 8) else 1
    Bt = max(_round_up(-(-B // n_btiles), 8), 8)         # per-tile batch (mult of 8)
    Bp = Bt * n_btiles                                   # total padded batch

    # gx chunk length: bound double-buffered gx scratch to ~4 MiB.
    gx_budget = 4 * 1024 * 1024
    Tc = max(1, min(T, gx_budget // max(1, 2 * Bt * 4 * Hp * 2)))
    n_chunks = (T + Tc - 1) // Tc

    # ---- glue: layout / padding / stacking of parameters (plain JAX) ----
    x = jnp.transpose(y, (1, 0, 2)).astype(jnp.float32)           # (T, B, D)
    x = jnp.pad(x, ((0, 0), (0, Bp - B), (0, P - D)))             # (T, Bp, P)
    x = x.reshape(T, n_btiles, Bt, P).transpose(1, 0, 2, 3)       # (n_btiles, T, Bt, P)
    x = x.astype(jnp.bfloat16)

    GATE_ORDER = (0, 1, 3, 2)   # PyTorch (i, f, g, o) -> kernel (i, f, o, g)

    def gate_pad_cols(w_t):
        # (rows, 4H) -> (rows, 4Hp): reorder gates and pad each to Hp columns.
        blocks = [jnp.pad(w_t[:, g * H:(g + 1) * H], ((0, 0), (0, Hp - H)))
                  for g in GATE_ORDER]
        return jnp.concatenate(blocks, axis=1)

    def gate_pad_vec(v):
        blocks = [jnp.pad(v[g * H:(g + 1) * H], (0, Hp - H)) for g in GATE_ORDER]
        return jnp.concatenate(blocks)

    w_ih_s, w_hh_s, b_s = [], [], []
    for l in range(L):
        w_ih_t = gate_pad_cols(params["w_ih"][l].T)                       # (in_l, 4Hp)
        w_ih_t = jnp.pad(w_ih_t, ((0, P - w_ih_t.shape[0]), (0, 0)))      # (P, 4Hp)
        w_ih_s.append(w_ih_t)
        w_hh_t = gate_pad_cols(params["w_hh"][l].T)                       # (H, 4Hp)
        w_hh_s.append(jnp.pad(w_hh_t, ((0, Hp - H), (0, 0))))             # (Hp, 4Hp)
        b_s.append(gate_pad_vec(params["b_ih"][l] + params["b_hh"][l])[None, :])
    w_ih_s = jnp.stack(w_ih_s).astype(jnp.bfloat16)                       # (L, P, 4Hp)
    w_hh_s = jnp.stack(w_hh_s).astype(jnp.bfloat16)                       # (L, Hp, 4Hp)
    b_s = jnp.stack(b_s).astype(jnp.float32)                              # (L, 1, 4Hp)

    fc_w_t = jnp.pad(params["fc_w"].T, ((0, Hp - H), (0, 0))).astype(jnp.float32)  # (Hp, O)
    fc_b = params["fc_b"][None, :].astype(jnp.float32)                             # (1, O)

    # ---- VMEM budget (per generation) ----
    seq_bytes = T * Bt * P * 2
    gx_bytes = 2 * Tc * Bt * 4 * Hp * 2
    wgt_bytes = 2 * (P * 4 * Hp * 2 + Hp * 4 * Hp * 2 + 4 * Hp * 4)   # double-buffered
    misc_bytes = Hp * O * 4 + O * 4 + 2 * Bt * O * 4
    needed = seq_bytes + gx_bytes + wgt_bytes + misc_bytes
    cap = (48 if is_v7 else 100) * 1024 * 1024
    vmem_limit = int(min(cap, max(32 * 1024 * 1024, int(needed * 1.5) + (2 << 20))))

    kernel = functools.partial(_lstm_hybrid_kernel,
                               hidden_pad=Hp, feat_pad=P, seq_len=T,
                               batch_tile=Bt, chunk_len=Tc,
                               use_bf16_act=use_bf16_act)

    # TODO(synk): when D >> H, keep a K=Hp sequence buffer for layers > 0 to
    # avoid contracting over zero-padded rows; for H << 128 a packed 4H-lane
    # gate layout would shrink the recurrent matmul/EUP width further.
    out = pl.pallas_call(
        kernel,
        out_shape=jax.ShapeDtypeStruct((Bp, O), jnp.float32),
        grid_spec=pltpu.PrefetchScalarGridSpec(
            num_scalar_prefetch=0,
            grid=(n_btiles, L),
            in_specs=[
                pl.BlockSpec(memory_space=pl.ANY),                          # x: HBM, manual DMA
                pl.BlockSpec((None, P, 4 * Hp), lambda b, l: (l, 0, 0)),    # W_ih^T (bf16)
                pl.BlockSpec((None, Hp, 4 * Hp), lambda b, l: (l, 0, 0)),   # W_hh^T (bf16)
                pl.BlockSpec((None, 1, 4 * Hp), lambda b, l: (l, 0, 0)),    # bias (f32)
                pl.BlockSpec((Hp, O), lambda b, l: (0, 0)),                 # fc weight^T
                pl.BlockSpec((1, O), lambda b, l: (0, 0)),                  # fc bias
            ],
            out_specs=pl.BlockSpec((Bt, O), lambda b, l: (b, 0)),
            scratch_shapes=[
                pltpu.VMEM((T, Bt, P), jnp.bfloat16),           # sequence buffer (layer I/O)
                pltpu.VMEM((2, Tc, Bt, 4 * Hp), jnp.bfloat16),  # double-buffered gx chunks
                pltpu.SemaphoreType.DMA((n_chunks,)),           # per-chunk layer-0 input DMAs
            ],
        ),
        compiler_params=pltpu.CompilerParams(
            dimension_semantics=("parallel", "arbitrary"),
            vmem_limit_bytes=vmem_limit),
    )(x, w_ih_s, w_hh_s, b_s, fc_w_t, fc_b)
    return out[:B]


def lstm_hybrid_ref(y, params, *, hidden_dim, num_layers):
    """Pure-JAX reference mirroring PyTorch nn.LSTM + Linear semantics."""
    if y.ndim == 2:
        y = y[:, None, :]
    B, T, _ = y.shape
    H = hidden_dim
    x = y.astype(jnp.float32)
    for l in range(num_layers):
        h = jnp.zeros((B, H), jnp.float32)
        c = jnp.zeros((B, H), jnp.float32)
        outs = []
        for t in range(T):
            gates = (x[:, t, :] @ params["w_ih"][l].T + params["b_ih"][l]
                     + h @ params["w_hh"][l].T + params["b_hh"][l])
            i_g = jax.nn.sigmoid(gates[:, 0:H])
            f_g = jax.nn.sigmoid(gates[:, H:2 * H])
            g_g = jnp.tanh(gates[:, 2 * H:3 * H])
            o_g = jax.nn.sigmoid(gates[:, 3 * H:4 * H])
            c = f_g * c + i_g * g_g
            h = o_g * jnp.tanh(c)
            outs.append(h)
        x = jnp.stack(outs, axis=1)
    return x[:, -1, :] @ params["fc_w"].T + params["fc_b"]


if __name__ == "__main__":
    input_dim, hidden_dim, num_layers, output_dim = 8, 32, 2, 4
    batch, seq = 2, 8

    key = jax.random.PRNGKey(0)
    key, ky = jax.random.split(key)
    y = jax.random.normal(ky, (batch, seq, input_dim), jnp.float32)
    t = jnp.float32(0.0)  # unused by the forward pass (matches PyTorch module)

    params = make_params(key, input_dim, hidden_dim, num_layers, output_dim)

    out = lstm_hybrid_forward(t, y, params,
                              hidden_dim=hidden_dim,
                              num_layers=num_layers,
                              output_dim=output_dim)
    out = jax.block_until_ready(out)

    ref = lstm_hybrid_ref(y, params, hidden_dim=hidden_dim, num_layers=num_layers)
    assert out.shape == (batch, output_dim)
    assert jnp.allclose(out, ref, atol=2e-2, rtol=2e-2), (out, ref)

    print("KERNEL_OK")
</pallas_src>

<mosaic_0001>
module attributes {stable_mosaic.version = 11 : i64} {
  func.func @_lstm_hybrid_kernel(%arg0: i32, %arg1: i32, %arg2: memref<1x8x8x128xbf16, #tpu.memory_space<any>>, %arg3: memref<1x128x512xbf16, #tpu.memory_space<vmem>>, %arg4: memref<1x128x512xbf16, #tpu.memory_space<vmem>>, %arg5: memref<1x1x512xf32, #tpu.memory_space<vmem>>, %arg6: memref<128x4xf32, #tpu.memory_space<vmem>>, %arg7: memref<1x4xf32, #tpu.memory_space<vmem>>, %arg8: memref<8x4xf32, #tpu.memory_space<vmem>>, %arg9: memref<8x8x128xbf16, #tpu.memory_space<vmem>>, %arg10: memref<2x8x8x512xbf16, #tpu.memory_space<vmem>>, %arg11: memref<1x!tpu.dma_semaphore, #tpu.memory_space<semaphore_mem>>) attributes {dimension_semantics = [#tpu.dimension_semantics<parallel>, #tpu.dimension_semantics<arbitrary>], iteration_bounds = array<i64: 1, 2>, scalar_prefetch = 0 : i64, scratch_operands = 3 : i64, tpu.core_type = #tpu.core_type<tc>, window_params = [{}, {transform_indices = @transform_1, window_bounds = array<i64: 1, 128, 512>}, {transform_indices = @transform_2, window_bounds = array<i64: 1, 128, 512>}, {transform_indices = @transform_3, window_bounds = array<i64: 1, 1, 512>}, {pipeline_mode = #tpu.pipeline_mode<synchronous>, transform_indices = @transform_4, window_bounds = array<i64: 128, 4>}, {pipeline_mode = #tpu.pipeline_mode<synchronous>, transform_indices = @transform_5, window_bounds = array<i64: 1, 4>}, {transform_indices = @transform_6, window_bounds = array<i64: 8, 4>}]} {
    %c0_i32 = arith.constant 0 : i32
    %0 = arith.cmpi eq, %arg1, %c0_i32 : i32
    %1 = arith.extui %0 : i1 to i32
    %c0_i32_0 = arith.constant 0 : i32
    %2 = arith.cmpi ne, %1, %c0_i32_0 : i32
    scf.if %2 {
      %c0_i32_87 = arith.constant 0 : i32
      %c0_i32_88 = arith.constant 0 : i32
      %c0_i32_89 = arith.constant 0 : i32
      %c0_i32_90 = arith.constant 0 : i32
      %251 = tpu.memref_slice %arg2[%arg0, %c0_i32_88, %c0_i32_89, %c0_i32_90] : memref<1x8x8x128xbf16, #tpu.memory_space<any>> -> memref<1x8x8x128xbf16, #tpu.memory_space<any>>
      %252 = tpu.memref_squeeze %251 : memref<1x8x8x128xbf16, #tpu.memory_space<any>> -> memref<8x8x128xbf16, #tpu.memory_space<any>>
      %c0_i32_91 = arith.constant 0 : i32
      %c0_i32_92 = arith.constant 0 : i32
      %c0_i32_93 = arith.constant 0 : i32
      %253 = tpu.memref_slice %arg9[%c0_i32_91, %c0_i32_92, %c0_i32_93] : memref<8x8x128xbf16, #tpu.memory_space<vmem>> -> memref<8x8x128xbf16, #tpu.memory_space<vmem>>
      %254 = tpu.memref_slice %arg11[%c0_i32_87] : memref<1x!tpu.dma_semaphore, #tpu.memory_space<semaphore_mem>> -> memref<1x!tpu.dma_semaphore, #tpu.memory_space<semaphore_mem>>
      %255 = tpu.memref_squeeze %254 : memref<1x!tpu.dma_semaphore, #tpu.memory_space<semaphore_mem>> -> memref<!tpu.dma_semaphore, #tpu.memory_space<semaphore_mem>>
      tpu.enqueue_dma source(%252 : memref<8x8x128xbf16, #tpu.memory_space<any>>) target(%253 : memref<8x8x128xbf16, #tpu.memory_space<vmem>>) target_semaphore(%255 : memref<!tpu.dma_semaphore, #tpu.memory_space<semaphore_mem>>)
    } else {
    }
    %c0 = arith.constant 0 : index
    %c0_1 = arith.constant 0 : index
    %c0_2 = arith.constant 0 : index
    %3 = vector.load %arg3[%c0, %c0_1, %c0_2] : memref<1x128x512xbf16, #tpu.memory_space<vmem>>, vector<1x128x512xbf16>
    %4 = vector.shape_cast %3 : vector<1x128x512xbf16> to vector<128x512xbf16>
    %c0_3 = arith.constant 0 : index
    %c0_4 = arith.constant 0 : index
    %c0_5 = arith.constant 0 : index
    %5 = vector.load %arg4[%c0_3, %c0_4, %c0_5] : memref<1x128x512xbf16, #tpu.memory_space<vmem>>, vector<1x128x512xbf16>
    %6 = vector.shape_cast %5 : vector<1x128x512xbf16> to vector<128x512xbf16>
    %c0_6 = arith.constant 0 : index
    %c0_7 = arith.constant 0 : index
    %c0_8 = arith.constant 0 : index
    %7 = vector.load %arg5[%c0_6, %c0_7, %c0_8] : memref<1x1x512xf32, #tpu.memory_space<vmem>>, vector<1x1x512xf32>
    %8 = vector.shape_cast %7 : vector<1x1x512xf32> to vector<1x512xf32>
    %cst = arith.constant 0.000000e+00 : bf16
    %9 = vector.broadcast %cst : bf16 to vector<8x128xbf16>
    %cst_9 = arith.constant 0.000000e+00 : f32
    %10 = vector.broadcast %cst_9 : f32 to vector<8x128xf32>
    %c0_i32_10 = arith.constant 0 : i32
    %11 = arith.cmpi eq, %arg1, %c0_i32_10 : i32
    %12 = arith.extui %11 : i1 to i32
    %c0_i32_11 = arith.constant 0 : i32
    %13 = arith.cmpi ne, %12, %c0_i32_11 : i32
    scf.if %13 {
      %c0_i32_87 = arith.constant 0 : i32
      %c0_i32_88 = arith.constant 0 : i32
      %c0_i32_89 = arith.constant 0 : i32
      %c0_i32_90 = arith.constant 0 : i32
      %251 = tpu.memref_slice %arg2[%arg0, %c0_i32_88, %c0_i32_89, %c0_i32_90] : memref<1x8x8x128xbf16, #tpu.memory_space<any>> -> memref<1x8x8x128xbf16, #tpu.memory_space<any>>
      %252 = tpu.memref_squeeze %251 : memref<1x8x8x128xbf16, #tpu.memory_space<any>> -> memref<8x8x128xbf16, #tpu.memory_space<any>>
      %c0_i32_91 = arith.constant 0 : i32
      %c0_i32_92 = arith.constant 0 : i32
      %c0_i32_93 = arith.constant 0 : i32
      %253 = tpu.memref_slice %arg9[%c0_i32_91, %c0_i32_92, %c0_i32_93] : memref<8x8x128xbf16, #tpu.memory_space<vmem>> -> memref<8x8x128xbf16, #tpu.memory_space<vmem>>
      %254 = tpu.memref_slice %arg11[%c0_i32_87] : memref<1x!tpu.dma_semaphore, #tpu.memory_space<semaphore_mem>> -> memref<1x!tpu.dma_semaphore, #tpu.memory_space<semaphore_mem>>
      %255 = tpu.memref_squeeze %254 : memref<1x!tpu.dma_semaphore, #tpu.memory_space<semaphore_mem>> -> memref<!tpu.dma_semaphore, #tpu.memory_space<semaphore_mem>>
      tpu.wait_dma2 semaphore(%255 : memref<!tpu.dma_semaphore, #tpu.memory_space<semaphore_mem>>) src(%252 : memref<8x8x128xbf16, #tpu.memory_space<any>>) dst(%253 : memref<8x8x128xbf16, #tpu.memory_space<vmem>>)
    } else {
    }
    %c0_12 = arith.constant 0 : index
    %c0_13 = arith.constant 0 : index
    %c0_14 = arith.constant 0 : index
    %14 = vector.load %arg9[%c0_12, %c0_13, %c0_14] : memref<8x8x128xbf16, #tpu.memory_space<vmem>>, vector<8x8x128xbf16>
    %15 = vector.shape_cast %14 : vector<8x8x128xbf16> to vector<64x128xbf16>
    %cst_15 = arith.constant dense<0.000000e+00> : vector<64x512xf32>
    %16 = tpu.matmul %15, %4, %cst_15 {dimension_numbers = #tpu.dot_dimension_numbers<[1], [0], [0], [1], [0, 0, 1, 1], [], []>} : vector<64x128xbf16>, vector<128x512xbf16>, vector<64x512xf32> -> vector<64x512xf32>
    %17 = vector.broadcast %8 : vector<1x512xf32> to vector<64x512xf32>
    %18 = arith.addf %16, %17 : vector<64x512xf32>
    %19 = arith.truncf %18 : vector<64x512xf32> to vector<64x512xbf16>
    %20 = vector.shape_cast %19 : vector<64x512xbf16> to vector<8x8x512xbf16>
    %c0_16 = arith.constant 0 : index
    %c0_17 = arith.constant 0 : index
    %c0_18 = arith.constant 0 : index
    %c0_19 = arith.constant 0 : index
    %21 = vector.load %arg10[%c0_16, %c0_17, %c0_18, %c0_19] : memref<2x8x8x512xbf16, #tpu.memory_space<vmem>>, vector<1x8x8x512xbf16>
    %22 = vector.shape_cast %21 : vector<1x8x8x512xbf16> to vector<8x8x512xbf16>
    %23 = vector.shape_cast %20 : vector<8x8x512xbf16> to vector<1x8x8x512xbf16>
    tpu.vector_store %arg10[%c0_16, %c0_17, %c0_18, %c0_19], %23 {strides = array<i32>} : memref<2x8x8x512xbf16, #tpu.memory_space<vmem>>, vector<1x8x8x512xbf16>,
    %c0_i32_20 = arith.constant 0 : i32
    %cst_21 = arith.constant dense<0.000000e+00> : vector<8x512xf32>
    %24 = tpu.matmul %9, %6, %cst_21 {dimension_numbers = #tpu.dot_dimension_numbers<[1], [0], [0], [1], [0, 0, 1, 1], [], []>} : vector<8x128xbf16>, vector<128x512xbf16>, vector<8x512xf32> -> vector<8x512xf32>
    %c0_22 = arith.constant 0 : index
    %25 = arith.index_cast %c0_i32_20 : i32 to index
    %c0_23 = arith.constant 0 : index
    %c0_24 = arith.constant 0 : index
    %26 = vector.load %arg10[%c0_22, %25, %c0_23, %c0_24] : memref<2x8x8x512xbf16, #tpu.memory_space<vmem>>, vector<1x1x8x512xbf16>
    %27 = vector.shape_cast %26 : vector<1x1x8x512xbf16> to vector<8x512xbf16>
    %28 = arith.extf %27 : vector<8x512xbf16> to vector<8x512xf32>
    %29 = arith.addf %24, %28 : vector<8x512xf32>
    %30 = vector.extract_strided_slice %29 {offsets = [0, 0], sizes = [8, 384], strides = [1, 1]} : vector<8x512xf32> to vector<8x384xf32>
    %31 = arith.negf %30 : vector<8x384xf32>
    %32 = math.exp %31 : vector<8x384xf32>
    %cst_25 = arith.constant 1.000000e+00 : f32
    %33 = vector.broadcast %cst_25 : f32 to vector<8x384xf32>
    %34 = arith.addf %33, %32 : vector<8x384xf32>
    %35 = arith.divf %33, %34 : vector<8x384xf32>
    %36 = vector.extract_strided_slice %35 {offsets = [0, 0], sizes = [8, 128], strides = [1, 1]} : vector<8x384xf32> to vector<8x128xf32>
    %37 = vector.extract_strided_slice %35 {offsets = [0, 128], sizes = [8, 128], strides = [1, 1]} : vector<8x384xf32> to vector<8x128xf32>
    %38 = vector.extract_strided_slice %35 {offsets = [0, 256], sizes = [8, 128], strides = [1, 1]} : vector<8x384xf32> to vector<8x128xf32>
    %39 = vector.extract_strided_slice %29 {offsets = [0, 384], sizes = [8, 128], strides = [1, 1]} : vector<8x512xf32> to vector<8x128xf32>
    %40 = math.tanh %39 : vector<8x128xf32>
    %41 = arith.mulf %37, %10 : vector<8x128xf32>
    %42 = arith.mulf %36, %40 : vector<8x128xf32>
    %43 = arith.addf %41, %42 : vector<8x128xf32>
    %44 = math.tanh %43 : vector<8x128xf32>
    %45 = arith.mulf %38, %44 : vector<8x128xf32>
    %46 = arith.truncf %45 : vector<8x128xf32> to vector<8x128xbf16>
    %c0_i32_26 = arith.constant 0 : i32
    %47 = arith.addi %c0_i32_26, %c0_i32_20 : i32
    %48 = arith.index_cast %47 : i32 to index
    %c0_27 = arith.constant 0 : index
    %c0_28 = arith.constant 0 : index
    %49 = vector.load %arg9[%48, %c0_27, %c0_28] : memref<8x8x128xbf16, #tpu.memory_space<vmem>>, vector<1x8x128xbf16>
    %50 = vector.shape_cast %49 : vector<1x8x128xbf16> to vector<8x128xbf16>
    %51 = vector.shape_cast %46 : vector<8x128xbf16> to vector<1x8x128xbf16>
    tpu.vector_store %arg9[%48, %c0_27, %c0_28], %51 {strides = array<i32>} : memref<8x8x128xbf16, #tpu.memory_space<vmem>>, vector<1x8x128xbf16>,
    %c1_i32 = arith.constant 1 : i32
    %cst_29 = arith.constant dense<0.000000e+00> : vector<8x512xf32>
    %52 = tpu.matmul %46, %6, %cst_29 {dimension_numbers = #tpu.dot_dimension_numbers<[1], [0], [0], [1], [0, 0, 1, 1], [], []>} : vector<8x128xbf16>, vector<128x512xbf16>, vector<8x512xf32> -> vector<8x512xf32>
    %c0_30 = arith.constant 0 : index
    %53 = arith.index_cast %c1_i32 : i32 to index
    %c0_31 = arith.constant 0 : index
    %c0_32 = arith.constant 0 : index
    %54 = vector.load %arg10[%c0_30, %53, %c0_31, %c0_32] : memref<2x8x8x512xbf16, #tpu.memory_space<vmem>>, vector<1x1x8x512xbf16>
    %55 = vector.shape_cast %54 : vector<1x1x8x512xbf16> to vector<8x512xbf16>
    %56 = arith.extf %55 : vector<8x512xbf16> to vector<8x512xf32>
    %57 = arith.addf %52, %56 : vector<8x512xf32>
    %58 = vector.extract_strided_slice %57 {offsets = [0, 0], sizes = [8, 384], strides = [1, 1]} : vector<8x512xf32> to vector<8x384xf32>
    %59 = arith.negf %58 : vector<8x384xf32>
    %60 = math.exp %59 : vector<8x384xf32>
    %cst_33 = arith.constant 1.000000e+00 : f32
    %61 = vector.broadcast %cst_33 : f32 to vector<8x384xf32>
    %62 = arith.addf %61, %60 : vector<8x384xf32>
    %63 = arith.divf %61, %62 : vector<8x384xf32>
    %64 = vector.extract_strided_slice %63 {offsets = [0, 0], sizes = [8, 128], strides = [1, 1]} : vector<8x384xf32> to vector<8x128xf32>
    %65 = vector.extract_strided_slice %63 {offsets = [0, 128], sizes = [8, 128], strides = [1, 1]} : vector<8x384xf32> to vector<8x128xf32>
    %66 = vector.extract_strided_slice %63 {offsets = [0, 256], sizes = [8, 128], strides = [1, 1]} : vector<8x384xf32> to vector<8x128xf32>
    %67 = vector.extract_strided_slice %57 {offsets = [0, 384], sizes = [8, 128], strides = [1, 1]} : vector<8x512xf32> to vector<8x128xf32>
    %68 = math.tanh %67 : vector<8x128xf32>
    %69 = arith.mulf %65, %43 : vector<8x128xf32>
    %70 = arith.mulf %64, %68 : vector<8x128xf32>
    %71 = arith.addf %69, %70 : vector<8x128xf32>
    %72 = math.tanh %71 : vector<8x128xf32>
    %73 = arith.mulf %66, %72 : vector<8x128xf32>
    %74 = arith.truncf %73 : vector<8x128xf32> to vector<8x128xbf16>
    %c0_i32_34 = arith.constant 0 : i32
    %75 = arith.addi %c0_i32_34, %c1_i32 : i32
    %76 = arith.index_cast %75 : i32 to index
    %c0_35 = arith.constant 0 : index
    %c0_36 = arith.constant 0 : index
    %77 = vector.load %arg9[%76, %c0_35, %c0_36] : memref<8x8x128xbf16, #tpu.memory_space<vmem>>, vector<1x8x128xbf16>
    %78 = vector.shape_cast %77 : vector<1x8x128xbf16> to vector<8x128xbf16>
    %79 = vector.shape_cast %74 : vector<8x128xbf16> to vector<1x8x128xbf16>
    tpu.vector_store %arg9[%76, %c0_35, %c0_36], %79 {strides = array<i32>} : memref<8x8x128xbf16, #tpu.memory_space<vmem>>, vector<1x8x128xbf16>,
    %c2_i32 = arith.constant 2 : i32
    %cst_37 = arith.constant dense<0.000000e+00> : vector<8x512xf32>
    %80 = tpu.matmul %74, %6, %cst_37 {dimension_numbers = #tpu.dot_dimension_numbers<[1], [0], [0], [1], [0, 0, 1, 1], [], []>} : vector<8x128xbf16>, vector<128x512xbf16>, vector<8x512xf32> -> vector<8x512xf32>
    %c0_38 = arith.constant 0 : index
    %81 = arith.index_cast %c2_i32 : i32 to index
    %c0_39 = arith.constant 0 : index
    %c0_40 = arith.constant 0 : index
    %82 = vector.load %arg10[%c0_38, %81, %c0_39, %c0_40] : memref<2x8x8x512xbf16, #tpu.memory_space<vmem>>, vector<1x1x8x512xbf16>
    %83 = vector.shape_cast %82 : vector<1x1x8x512xbf16> to vector<8x512xbf16>
    %84 = arith.extf %83 : vector<8x512xbf16> to vector<8x512xf32>
    %85 = arith.addf %80, %84 : vector<8x512xf32>
    %86 = vector.extract_strided_slice %85 {offsets = [0, 0], sizes = [8, 384], strides = [1, 1]} : vector<8x512xf32> to vector<8x384xf32>
    %87 = arith.negf %86 : vector<8x384xf32>
    %88 = math.exp %87 : vector<8x384xf32>
    %cst_41 = arith.constant 1.000000e+00 : f32
    %89 = vector.broadcast %cst_41 : f32 to vector<8x384xf32>
    %90 = arith.addf %89, %88 : vector<8x384xf32>
    %91 = arith.divf %89, %90 : vector<8x384xf32>
    %92 = vector.extract_strided_slice %91 {offsets = [0, 0], sizes = [8, 128], strides = [1, 1]} : vector<8x384xf32> to vector<8x128xf32>
    %93 = vector.extract_strided_slice %91 {offsets = [0, 128], sizes = [8, 128], strides = [1, 1]} : vector<8x384xf32> to vector<8x128xf32>
    %94 = vector.extract_strided_slice %91 {offsets = [0, 256], sizes = [8, 128], strides = [1, 1]} : vector<8x384xf32> to vector<8x128xf32>
    %95 = vector.extract_strided_slice %85 {offsets = [0, 384], sizes = [8, 128], strides = [1, 1]} : vector<8x512xf32> to vector<8x128xf32>
    %96 = math.tanh %95 : vector<8x128xf32>
    %97 = arith.mulf %93, %71 : vector<8x128xf32>
    %98 = arith.mulf %92, %96 : vector<8x128xf32>
    %99 = arith.addf %97, %98 : vector<8x128xf32>
    %100 = math.tanh %99 : vector<8x128xf32>
    %101 = arith.mulf %94, %100 : vector<8x128xf32>
    %102 = arith.truncf %101 : vector<8x128xf32> to vector<8x128xbf16>
    %c0_i32_42 = arith.constant 0 : i32
    %103 = arith.addi %c0_i32_42, %c2_i32 : i32
    %104 = arith.index_cast %103 : i32 to index
    %c0_43 = arith.constant 0 : index
    %c0_44 = arith.constant 0 : index
    %105 = vector.load %arg9[%104, %c0_43, %c0_44] : memref<8x8x128xbf16, #tpu.memory_space<vmem>>, vector<1x8x128xbf16>
    %106 = vector.shape_cast %105 : vector<1x8x128xbf16> to vector<8x128xbf16>
    %107 = vector.shape_cast %102 : vector<8x128xbf16> to vector<1x8x128xbf16>
    tpu.vector_store %arg9[%104, %c0_43, %c0_44], %107 {strides = array<i32>} : memref<8x8x128xbf16, #tpu.memory_space<vmem>>, vector<1x8x128xbf16>,
    %c3_i32 = arith.constant 3 : i32
    %cst_45 = arith.constant dense<0.000000e+00> : vector<8x512xf32>
    %108 = tpu.matmul %102, %6, %cst_45 {dimension_numbers = #tpu.dot_dimension_numbers<[1], [0], [0], [1], [0, 0, 1, 1], [], []>} : vector<8x128xbf16>, vector<128x512xbf16>, vector<8x512xf32> -> vector<8x512xf32>
    %c0_46 = arith.constant 0 : index
    %109 = arith.index_cast %c3_i32 : i32 to index
    %c0_47 = arith.constant 0 : index
    %c0_48 = arith.constant 0 : index
    %110 = vector.load %arg10[%c0_46, %109, %c0_47, %c0_48] : memref<2x8x8x512xbf16, #tpu.memory_space<vmem>>, vector<1x1x8x512xbf16>
    %111 = vector.shape_cast %110 : vector<1x1x8x512xbf16> to vector<8x512xbf16>
    %112 = arith.extf %111 : vector<8x512xbf16> to vector<8x512xf32>
    %113 = arith.addf %108, %112 : vector<8x512xf32>
    %114 = vector.extract_strided_slice %113 {offsets = [0, 0], sizes = [8, 384], strides = [1, 1]} : vector<8x512xf32> to vector<8x384xf32>
    %115 = arith.negf %114 : vector<8x384xf32>
    %116 = math.exp %115 : vector<8x384xf32>
    %cst_49 = arith.constant 1.000000e+00 : f32
    %117 = vector.broadcast %cst_49 : f32 to vector<8x384xf32>
    %118 = arith.addf %117, %116 : vector<8x384xf32>
    %119 = arith.divf %117, %118 : vector<8x384xf32>
    %120 = vector.extract_strided_slice %119 {offsets = [0, 0], sizes = [8, 128], strides = [1, 1]} : vector<8x384xf32> to vector<8x128xf32>
    %121 = vector.extract_strided_slice %119 {offsets = [0, 128], sizes = [8, 128], strides = [1, 1]} : vector<8x384xf32> to vector<8x128xf32>
    %122 = vector.extract_strided_slice %119 {offsets = [0, 256], sizes = [8, 128], strides = [1, 1]} : vector<8x384xf32> to vector<8x128xf32>
    %123 = vector.extract_strided_slice %113 {offsets = [0, 384], sizes = [8, 128], strides = [1, 1]} : vector<8x512xf32> to vector<8x128xf32>
    %124 = math.tanh %123 : vector<8x128xf32>
    %125 = arith.mulf %121, %99 : vector<8x128xf32>
    %126 = arith.mulf %120, %124 : vector<8x128xf32>
    %127 = arith.addf %125, %126 : vector<8x128xf32>
    %128 = math.tanh %127 : vector<8x128xf32>
    %129 = arith.mulf %122, %128 : vector<8x128xf32>
    %130 = arith.truncf %129 : vector<8x128xf32> to vector<8x128xbf16>
    %c0_i32_50 = arith.constant 0 : i32
    %131 = arith.addi %c0_i32_50, %c3_i32 : i32
    %132 = arith.index_cast %131 : i32 to index
    %c0_51 = arith.constant 0 : index
    %c0_52 = arith.constant 0 : index
    %133 = vector.load %arg9[%132, %c0_51, %c0_52] : memref<8x8x128xbf16, #tpu.memory_space<vmem>>, vector<1x8x128xbf16>
    %134 = vector.shape_cast %133 : vector<1x8x128xbf16> to vector<8x128xbf16>
    %135 = vector.shape_cast %130 : vector<8x128xbf16> to vector<1x8x128xbf16>
    tpu.vector_store %arg9[%132, %c0_51, %c0_52], %135 {strides = array<i32>} : memref<8x8x128xbf16, #tpu.memory_space<vmem>>, vector<1x8x128xbf16>,
    %c4_i32 = arith.constant 4 : i32
    %cst_53 = arith.constant dense<0.000000e+00> : vector<8x512xf32>
    %136 = tpu.matmul %130, %6, %cst_53 {dimension_numbers = #tpu.dot_dimension_numbers<[1], [0], [0], [1], [0, 0, 1, 1], [], []>} : vector<8x128xbf16>, vector<128x512xbf16>, vector<8x512xf32> -> vector<8x512xf32>
    %c0_54 = arith.constant 0 : index
    %137 = arith.index_cast %c4_i32 : i32 to index
    %c0_55 = arith.constant 0 : index
    %c0_56 = arith.constant 0 : index
    %138 = vector.load %arg10[%c0_54, %137, %c0_55, %c0_56] : memref<2x8x8x512xbf16, #tpu.memory_space<vmem>>, vector<1x1x8x512xbf16>
    %139 = vector.shape_cast %138 : vector<1x1x8x512xbf16> to vector<8x512xbf16>
    %140 = arith.extf %139 : vector<8x512xbf16> to vector<8x512xf32>
    %141 = arith.addf %136, %140 : vector<8x512xf32>
    %142 = vector.extract_strided_slice %141 {offsets = [0, 0], sizes = [8, 384], strides = [1, 1]} : vector<8x512xf32> to vector<8x384xf32>
    %143 = arith.negf %142 : vector<8x384xf32>
    %144 = math.exp %143 : vector<8x384xf32>
    %cst_57 = arith.constant 1.000000e+00 : f32
    %145 = vector.broadcast %cst_57 : f32 to vector<8x384xf32>
    %146 = arith.addf %145, %144 : vector<8x384xf32>
    %147 = arith.divf %145, %146 : vector<8x384xf32>
    %148 = vector.extract_strided_slice %147 {offsets = [0, 0], sizes = [8, 128], strides = [1, 1]} : vector<8x384xf32> to vector<8x128xf32>
    %149 = vector.extract_strided_slice %147 {offsets = [0, 128], sizes = [8, 128], strides = [1, 1]} : vector<8x384xf32> to vector<8x128xf32>
    %150 = vector.extract_strided_slice %147 {offsets = [0, 256], sizes = [8, 128], strides = [1, 1]} : vector<8x384xf32> to vector<8x128xf32>
    %151 = vector.extract_strided_slice %141 {offsets = [0, 384], sizes = [8, 128], strides = [1, 1]} : vector<8x512xf32> to vector<8x128xf32>
    %152 = math.tanh %151 : vector<8x128xf32>
    %153 = arith.mulf %149, %127 : vector<8x128xf32>
    %154 = arith.mulf %148, %152 : vector<8x128xf32>
    %155 = arith.addf %153, %154 : vector<8x128xf32>
    %156 = math.tanh %155 : vector<8x128xf32>
    %157 = arith.mulf %150, %156 : vector<8x128xf32>
    %158 = arith.truncf %157 : vector<8x128xf32> to vector<8x128xbf16>
    %c0_i32_58 = arith.constant 0 : i32
    %159 = arith.addi %c0_i32_58, %c4_i32 : i32
    %160 = arith.index_cast %159 : i32 to index
    %c0_59 = arith.constant 0 : index
    %c0_60 = arith.constant 0 : index
    %161 = vector.load %arg9[%160, %c0_59, %c0_60] : memref<8x8x128xbf16, #tpu.memory_space<vmem>>, vector<1x8x128xbf16>
    %162 = vector.shape_cast %161 : vector<1x8x128xbf16> to vector<8x128xbf16>
    %163 = vector.shape_cast %158 : vector<8x128xbf16> to vector<1x8x128xbf16>
    tpu.vector_store %arg9[%160, %c0_59, %c0_60], %163 {strides = array<i32>} : memref<8x8x128xbf16, #tpu.memory_space<vmem>>, vector<1x8x128xbf16>,
    %c5_i32 = arith.constant 5 : i32
    %cst_61 = arith.constant dense<0.000000e+00> : vector<8x512xf32>
    %164 = tpu.matmul %158, %6, %cst_61 {dimension_numbers = #tpu.dot_dimension_numbers<[1], [0], [0], [1], [0, 0, 1, 1], [], []>} : vector<8x128xbf16>, vector<128x512xbf16>, vector<8x512xf32> -> vector<8x512xf32>
    %c0_62 = arith.constant 0 : index
    %165 = arith.index_cast %c5_i32 : i32 to index
    %c0_63 = arith.constant 0 : index
    %c0_64 = arith.constant 0 : index
    %166 = vector.load %arg10[%c0_62, %165, %c0_63, %c0_64] : memref<2x8x8x512xbf16, #tpu.memory_space<vmem>>, vector<1x1x8x512xbf16>
    %167 = vector.shape_cast %166 : vector<1x1x8x512xbf16> to vector<8x512xbf16>
    %168 = arith.extf %167 : vector<8x512xbf16> to vector<8x512xf32>
    %169 = arith.addf %164, %168 : vector<8x512xf32>
    %170 = vector.extract_strided_slice %169 {offsets = [0, 0], sizes = [8, 384], strides = [1, 1]} : vector<8x512xf32> to vector<8x384xf32>
    %171 = arith.negf %170 : vector<8x384xf32>
    %172 = math.exp %171 : vector<8x384xf32>
    %cst_65 = arith.constant 1.000000e+00 : f32
    %173 = vector.broadcast %cst_65 : f32 to vector<8x384xf32>
    %174 = arith.addf %173, %172 : vector<8x384xf32>
    %175 = arith.divf %173, %174 : vector<8x384xf32>
    %176 = vector.extract_strided_slice %175 {offsets = [0, 0], sizes = [8, 128], strides = [1, 1]} : vector<8x384xf32> to vector<8x128xf32>
    %177 = vector.extract_strided_slice %175 {offsets = [0, 128], sizes = [8, 128], strides = [1, 1]} : vector<8x384xf32> to vector<8x128xf32>
    %178 = vector.extract_strided_slice %175 {offsets = [0, 256], sizes = [8, 128], strides = [1, 1]} : vector<8x384xf32> to vector<8x128xf32>
    %179 = vector.extract_strided_slice %169 {offsets = [0, 384], sizes = [8, 128], strides = [1, 1]} : vector<8x512xf32> to vector<8x128xf32>
    %180 = math.tanh %179 : vector<8x128xf32>
    %181 = arith.mulf %177, %155 : vector<8x128xf32>
    %182 = arith.mulf %176, %180 : vector<8x128xf32>
    %183 = arith.addf %181, %182 : vector<8x128xf32>
    %184 = math.tanh %183 : vector<8x128xf32>
    %185 = arith.mulf %178, %184 : vector<8x128xf32>
    %186 = arith.truncf %185 : vector<8x128xf32> to vector<8x128xbf16>
    %c0_i32_66 = arith.constant 0 : i32
    %187 = arith.addi %c0_i32_66, %c5_i32 : i32
    %188 = arith.index_cast %187 : i32 to index
    %c0_67 = arith.constant 0 : index
    %c0_68 = arith.constant 0 : index
    %189 = vector.load %arg9[%188, %c0_67, %c0_68] : memref<8x8x128xbf16, #tpu.memory_space<vmem>>, vector<1x8x128xbf16>
    %190 = vector.shape_cast %189 : vector<1x8x128xbf16> to vector<8x128xbf16>
    %191 = vector.shape_cast %186 : vector<8x128xbf16> to vector<1x8x128xbf16>
    tpu.vector_store %arg9[%188, %c0_67, %c0_68], %191 {strides = array<i32>} : memref<8x8x128xbf16, #tpu.memory_space<vmem>>, vector<1x8x128xbf16>,
    %c6_i32 = arith.constant 6 : i32
    %cst_69 = arith.constant dense<0.000000e+00> : vector<8x512xf32>
    %192 = tpu.matmul %186, %6, %cst_69 {dimension_numbers = #tpu.dot_dimension_numbers<[1], [0], [0], [1], [0, 0, 1, 1], [], []>} : vector<8x128xbf16>, vector<128x512xbf16>, vector<8x512xf32> -> vector<8x512xf32>
    %c0_70 = arith.constant 0 : index
    %193 = arith.index_cast %c6_i32 : i32 to index
    %c0_71 = arith.constant 0 : index
    %c0_72 = arith.constant 0 : index
    %194 = vector.load %arg10[%c0_70, %193, %c0_71, %c0_72] : memref<2x8x8x512xbf16, #tpu.memory_space<vmem>>, vector<1x1x8x512xbf16>
    %195 = vector.shape_cast %194 : vector<1x1x8x512xbf16> to vector<8x512xbf16>
    %196 = arith.extf %195 : vector<8x512xbf16> to vector<8x512xf32>
    %197 = arith.addf %192, %196 : vector<8x512xf32>
    %198 = vector.extract_strided_slice %197 {offsets = [0, 0], sizes = [8, 384], strides = [1, 1]} : vector<8x512xf32> to vector<8x384xf32>
    %199 = arith.negf %198 : vector<8x384xf32>
    %200 = math.exp %199 : vector<8x384xf32>
    %cst_73 = arith.constant 1.000000e+00 : f32
    %201 = vector.broadcast %cst_73 : f32 to vector<8x384xf32>
    %202 = arith.addf %201, %200 : vector<8x384xf32>
    %203 = arith.divf %201, %202 : vector<8x384xf32>
    %204 = vector.extract_strided_slice %203 {offsets = [0, 0], sizes = [8, 128], strides = [1, 1]} : vector<8x384xf32> to vector<8x128xf32>
    %205 = vector.extract_strided_slice %203 {offsets = [0, 128], sizes = [8, 128], strides = [1, 1]} : vector<8x384xf32> to vector<8x128xf32>
    %206 = vector.extract_strided_slice %203 {offsets = [0, 256], sizes = [8, 128], strides = [1, 1]} : vector<8x384xf32> to vector<8x128xf32>
    %207 = vector.extract_strided_slice %197 {offsets = [0, 384], sizes = [8, 128], strides = [1, 1]} : vector<8x512xf32> to vector<8x128xf32>
    %208 = math.tanh %207 : vector<8x128xf32>
    %209 = arith.mulf %205, %183 : vector<8x128xf32>
    %210 = arith.mulf %204, %208 : vector<8x128xf32>
    %211 = arith.addf %209, %210 : vector<8x128xf32>
    %212 = math.tanh %211 : vector<8x128xf32>
    %213 = arith.mulf %206, %212 : vector<8x128xf32>
    %214 = arith.truncf %213 : vector<8x128xf32> to vector<8x128xbf16>
    %c0_i32_74 = arith.constant 0 : i32
    %215 = arith.addi %c0_i32_74, %c6_i32 : i32
    %216 = arith.index_cast %215 : i32 to index
    %c0_75 = arith.constant 0 : index
    %c0_76 = arith.constant 0 : index
    %217 = vector.load %arg9[%216, %c0_75, %c0_76] : memref<8x8x128xbf16, #tpu.memory_space<vmem>>, vector<1x8x128xbf16>
    %218 = vector.shape_cast %217 : vector<1x8x128xbf16> to vector<8x128xbf16>
    %219 = vector.shape_cast %214 : vector<8x128xbf16> to vector<1x8x128xbf16>
    tpu.vector_store %arg9[%216, %c0_75, %c0_76], %219 {strides = array<i32>} : memref<8x8x128xbf16, #tpu.memory_space<vmem>>, vector<1x8x128xbf16>,
    %c7_i32 = arith.constant 7 : i32
    %cst_77 = arith.constant dense<0.000000e+00> : vector<8x512xf32>
    %220 = tpu.matmul %214, %6, %cst_77 {dimension_numbers = #tpu.dot_dimension_numbers<[1], [0], [0], [1], [0, 0, 1, 1], [], []>} : vector<8x128xbf16>, vector<128x512xbf16>, vector<8x512xf32> -> vector<8x512xf32>
    %c0_78 = arith.constant 0 : index
    %221 = arith.index_cast %c7_i32 : i32 to index
    %c0_79 = arith.constant 0 : index
    %c0_80 = arith.constant 0 : index
    %222 = vector.load %arg10[%c0_78, %221, %c0_79, %c0_80] : memref<2x8x8x512xbf16, #tpu.memory_space<vmem>>, vector<1x1x8x512xbf16>
    %223 = vector.shape_cast %222 : vector<1x1x8x512xbf16> to vector<8x512xbf16>
    %224 = arith.extf %223 : vector<8x512xbf16> to vector<8x512xf32>
    %225 = arith.addf %220, %224 : vector<8x512xf32>
    %226 = vector.extract_strided_slice %225 {offsets = [0, 0], sizes = [8, 384], strides = [1, 1]} : vector<8x512xf32> to vector<8x384xf32>
    %227 = arith.negf %226 : vector<8x384xf32>
    %228 = math.exp %227 : vector<8x384xf32>
    %cst_81 = arith.constant 1.000000e+00 : f32
    %229 = vector.broadcast %cst_81 : f32 to vector<8x384xf32>
    %230 = arith.addf %229, %228 : vector<8x384xf32>
    %231 = arith.divf %229, %230 : vector<8x384xf32>
    %232 = vector.extract_strided_slice %231 {offsets = [0, 0], sizes = [8, 128], strides = [1, 1]} : vector<8x384xf32> to vector<8x128xf32>
    %233 = vector.extract_strided_slice %231 {offsets = [0, 128], sizes = [8, 128], strides = [1, 1]} : vector<8x384xf32> to vector<8x128xf32>
    %234 = vector.extract_strided_slice %231 {offsets = [0, 256], sizes = [8, 128], strides = [1, 1]} : vector<8x384xf32> to vector<8x128xf32>
    %235 = vector.extract_strided_slice %225 {offsets = [0, 384], sizes = [8, 128], strides = [1, 1]} : vector<8x512xf32> to vector<8x128xf32>
    %236 = math.tanh %235 : vector<8x128xf32>
    %237 = arith.mulf %233, %211 : vector<8x128xf32>
    %238 = arith.mulf %232, %236 : vector<8x128xf32>
    %239 = arith.addf %237, %238 : vector<8x128xf32>
    %240 = math.tanh %239 : vector<8x128xf32>
    %241 = arith.mulf %234, %240 : vector<8x128xf32>
    %242 = arith.truncf %241 : vector<8x128xf32> to vector<8x128xbf16>
    %c0_i32_82 = arith.constant 0 : i32
    %243 = arith.addi %c0_i32_82, %c7_i32 : i32
    %244 = arith.index_cast %243 : i32 to index
    %c0_83 = arith.constant 0 : index
    %c0_84 = arith.constant 0 : index
    %245 = vector.load %arg9[%244, %c0_83, %c0_84] : memref<8x8x128xbf16, #tpu.memory_space<vmem>>, vector<1x8x128xbf16>
    %246 = vector.shape_cast %245 : vector<1x8x128xbf16> to vector<8x128xbf16>
    %247 = vector.shape_cast %242 : vector<8x128xbf16> to vector<1x8x128xbf16>
    tpu.vector_store %arg9[%244, %c0_83, %c0_84], %247 {strides = array<i32>} : memref<8x8x128xbf16, #tpu.memory_space<vmem>>, vector<1x8x128xbf16>,
    %c8_i32 = arith.constant 8 : i32
    %c1_i32_85 = arith.constant 1 : i32
    %248 = arith.cmpi eq, %arg1, %c1_i32_85 : i32
    %249 = arith.extui %248 : i1 to i32
    %c0_i32_86 = arith.constant 0 : i32
    %250 = arith.cmpi ne, %249, %c0_i32_86 : i32
    scf.if %250 {
      %251 = arith.extf %242 : vector<8x128xbf16> to vector<8x128xf32>
      %c0_87 = arith.constant 0 : index
      %c0_88 = arith.constant 0 : index
      %252 = vector.load %arg6[%c0_87, %c0_88] : memref<128x4xf32, #tpu.memory_space<vmem>>, vector<128x4xf32>
      %cst_89 = arith.constant dense<0.000000e+00> : vector<8x4xf32>
      %253 = tpu.matmul %251, %252, %cst_89 {dimension_numbers = #tpu.dot_dimension_numbers<[1], [0], [0], [1], [0, 0, 1, 1], [], []>} : vector<8x128xf32>, vector<128x4xf32>, vector<8x4xf32> -> vector<8x4xf32>
      %c0_90 = arith.constant 0 : index
      %c0_91 = arith.constant 0 : index
      %254 = vector.load %arg7[%c0_90, %c0_91] : memref<1x4xf32, #tpu.memory_space<vmem>>, vector<1x4xf32>
      %255 = vector.broadcast %254 : vector<1x4xf32> to vector<8x4xf32>
      %256 = arith.addf %253, %255 : vector<8x4xf32>
      %c0_92 = arith.constant 0 : index
      %c0_93 = arith.constant 0 : index
      %257 = vector.load %arg8[%c0_92, %c0_93] : memref<8x4xf32, #tpu.memory_space<vmem>>, vector<8x4xf32>
      tpu.vector_store %arg8[%c0_92, %c0_93], %256 {strides = array<i32>} : memref<8x4xf32, #tpu.memory_space<vmem>>, vector<8x4xf32>,
    } else {
    }
    return
  }
  func.func @transform_1(%arg0: i32, %arg1: i32) -> (i32, i32, i32) {
    %c0_i32 = arith.constant 0 : i32
    %c0_i32_0 = arith.constant 0 : i32
    %c0_i32_1 = arith.constant 0 : i32
    return %arg1, %c0_i32, %c0_i32_0 : i32, i32, i32
  }
  func.func @transform_2(%arg0: i32, %arg1: i32) -> (i32, i32, i32) {
    %c0_i32 = arith.constant 0 : i32
    %c0_i32_0 = arith.constant 0 : i32
    %c0_i32_1 = arith.constant 0 : i32
    return %arg1, %c0_i32, %c0_i32_0 : i32, i32, i32
  }
  func.func @transform_3(%arg0: i32, %arg1: i32) -> (i32, i32, i32) {
    %c0_i32 = arith.constant 0 : i32
    %c0_i32_0 = arith.constant 0 : i32
    %c0_i32_1 = arith.constant 0 : i32
    return %arg1, %c0_i32, %c0_i32_0 : i32, i32, i32
  }
  func.func @transform_4(%arg0: i32, %arg1: i32) -> (i32, i32) {
    %c0_i32 = arith.constant 0 : i32
    %c0_i32_0 = arith.constant 0 : i32
    %c0_i32_1 = arith.constant 0 : i32
    return %c0_i32, %c0_i32_0 : i32, i32
  }
  func.func @transform_5(%arg0: i32, %arg1: i32) -> (i32, i32) {
    %c0_i32 = arith.constant 0 : i32
    %c0_i32_0 = arith.constant 0 : i32
    %c0_i32_1 = arith.constant 0 : i32
    return %c0_i32, %c0_i32_0 : i32, i32
  }
  func.func @transform_6(%arg0: i32, %arg1: i32) -> (i32, i32) {
    %c0_i32 = arith.constant 0 : i32
    %c0_i32_0 = arith.constant 0 : i32
    return %arg0, %c0_i32 : i32, i32
  }
}

</mosaic_0001>

<bundles_post_ra>
// kernel: tpu_custom_call.1
= control target key start
LH: loop header
LB: loop body
LE: loop exit
PB: predicated region body
PF: predicated region fallthrough
CT: control target
= control target key end

     0   :  { %11 = vsyncpa [#allocation6], 0  ;;  %s3871_s0 = inlined_call_operand.vmem [shape: bf16[1,8,8,128], index: 0, kind: input, shape index: {}]   ;;  %s3872_s1 = inlined_call_operand.hbm [shape: bf16[2,128,512], index: 1, kind: input, shape index: {}]   ;;  %s3873_s2 = inlined_call_operand.hbm [shape: bf16[2,128,512], index: 2, kind: input, shape index: {}]   ;;  %s3874_s3 = inlined_call_operand.vmem [shape: f32[2,1,512], index: 3, kind: input, shape index: {}]   ;;  %s3875_s4 = inlined_call_operand.vmem [shape: f32[128,4], index: 4, kind: input, shape index: {}]   ;;  %s3876_s5 = inlined_call_operand.vmem [shape: f32[1,4], index: 5, kind: input, shape index: {}]   ;;  %s3877_s6 = inlined_call_operand.vmem [shape: f32[8,4], index: 6, kind: output, shape index: {}]  }
   0x1   :  { %13 = vsyncpa [#allocation6 + $0x1], 0 }
   0x2   :  { %14 = vsyncpa [#allocation8], 0 }
   0x3   :  { %16 = vsyncpa [#allocation8 + $0x1], 0  ;;  %s2807_s21 = smov 0   ;;  %s2809_s22 = smov 0  }
   0x4   :  { %s2811_s23 = smov 0   ;;  %s2813_s24 = smov 0  }
   0x5   :  { %s2815_s25 = smov 0   ;;  %s2817_s26 = smov 0  }
   0x6 LB: > { %s2220_s27 = sadd.s32 4294967295, %s2762_s26   ;;  %s31_s28 = sadd.s32 1, %s2758_s25  ;;  %s2762_s26 = sphi %s2817_s26, %s22_s26   ;;  %s2758_s25 = sphi %s2815_s25, %s3930_s25   ;;  %s2754_s24 = sphi %s2813_s24, %s3929_s24   ;;  %s2750_s23 = sphi %s2811_s23, %s3928_s23   ;;  %s2746_s22 = sphi %s2809_s22, %s3927_s22   ;;  %s2742_s21 = sphi %s2807_s21, %s3926_s21  }
   0x7   : > { %p32_p0 = scmp.ge.s32.totalorder %s31_s28, 2  ;;  %s41_s29 = sadd.s32 1, %s2750_s23 }
   0x8   : > { %p48_p1 = scmp.ne.s32.totalorder %s2750_s23, %s2746_s22  ;;  %p49_p2 = scmp.eq.s32.totalorder %s2762_s26, 0 }
   0x9   : > { %s3932_s28 = smov (%p32_p0, %s31_s28), 0  ;;  %p54_p4 = scmp.ne.s32.totalorder %s2746_s22, %s2742_s21 }
   0xa   : > { %p2843_p3 = por %p49_p2, %p48_p1  ;;  %s38_s7 = ssub.s32 %s2758_s25, %s3932_s28 }
   0xb   : > { %p55_p5 = scmp.eq.s32.totalorder %s2220_s27, 0  ;;  %p39_p6 = scmp.eq.s32.totalorder %s38_s7, 0 }
   0xc   : > { %p2456_p8 = scmp.lt.s32.totalorder %s2762_s26, 2  ;;  %s2859_s10 = sand.u32 1, %s2750_s23  }
   0xd   : > { %p2850_p7 = por %p55_p5, %p54_p4  ;;  %s2349_s11 = sshll.u32 %s2758_s25, 12 }
   0xe   : > { %s2856_s9 = scalar_select %p39_p6, %s2750_s23, %s41_s29  }
   0xf   : > { %s3895_s8 = scalar_select %p2850_p7, 1, 0 }
  0x10   : > { %s2223_s12 = sshll.u32 %s2859_s10, 8  ;;  %s2868_s15 = scalar_lea.hbm %s3872_s1, %s2349_s11 }
  0x11   : > { %s208_s16 = scalar_lea.vmem [#allocation5], %s2223_s12  ;;  %p2874_p9 = pnand %p2456_p8, %p2843_p3 }
  0x12   : > { %s215_s17 = sshll.u32 %s208_s16, 4  ;;  %s205_s19 = scalar_lea.sflag [#allocation6], %s2859_s10  ;;  %s2878_s17 = int_to_ptr.vmem [resolvable:$true] %s215_s17 }
  0x13   : > { %s2644_s20 = scalar_lea.hbm %s2868_s15, 4096  ;;  %p2646_p11 = pneg %p2874_p9 }
  0x14   : > { %p2645_p10 = scmp.ne.s32.totalorder %s2868_s15, %s2644_s20  ;;  %s2649_s29 = scalar_lea.hbm %s3872_s1, 8192 }
  0x15   : > { %p2650_p0 = scmp.lt.u32.totalorder %s2868_s15, %s3872_s1  ;;  %p2651_p1 = scmp.lt.u32.totalorder %s2649_s29, %s2644_s20 }
  0x16   : > { %p2647_p12 = pnand %p2646_p11, %p2645_p10  ;;  %p2653_p3 = scmp.lt.u32.totalorder %s2644_s20, %s2868_s15 }
  0x17   : > { %p2652_p2 = por %p2651_p1, %p2650_p0 }
  0x18   : > { %p2648_p13 = pneg %p2647_p12 }
  0x19   : > { %p2654_p4 = por %p2653_p3, %p2652_p2 }
  0x1b   : > { %p2655_p5 = pnand %p2654_p4, %p2648_p13 }
  0x1d   : > { %2658 = shalt.err (!%p2655_p5)
}
  0x1e   : > { %s2659_s13 = scalar_lea.vmem %s2878_s17, 4096  ;;  %s2764_s14 = smov [#allocation5]  }
  0x1f   : > { %p2660_p6 = scmp.ne.s32.totalorder %s2878_s17, %s2659_s13  ;;  %s2664_s16 = sshll.u32 %s2764_s14, 4  ;;  %s2665_s16 = int_to_ptr.vmem [resolvable:$false] %s2664_s16 }
  0x20   : > { %s2666_s21 = scalar_lea.vmem %s2665_s16, 8192  ;;  %p2667_p12 = scmp.lt.s32.totalorder %s2878_s17, %s2665_s16 }
  0x21   : > { %p2662_p8 = pnand %p2660_p6, %p2646_p11  ;;  %p2668_p0 = scmp.lt.s32.totalorder %s2666_s21, %s2659_s13 }
  0x23   : > { %p2663_p10 = pneg %p2662_p8  ;;  %p2669_p1 = por %p2668_p0, %p2667_p12 }
  0x25   : > { %p2670_p2 = pnand %p2669_p1, %p2663_p10 }
  0x27   : > { %2673 = shalt.err (!%p2670_p2)
}
  0x28   : > { %s2765_s20 = smov 256   ;;  %s2766_s27 = smov 16  }
  0x29   : > { %2452 = dma.hbm_to_vmem [thread:$0]  (!%p2874_p9), %s2868_s15, 4096, %s2878_s17, %s205_s19, %s2765_s20, %s2765_s20, %s2766_s27  }
  0x2a   : > { %p2229_p13 = scmp.ge.s32.totalorder %s2762_s26, 1  ;;  %p251_p3 = scmp.lt.s32.totalorder %s2762_s26, 3 }
  0x2b   : > { %s2922_s13 = scalar_lea.hbm %s3873_s2, %s2349_s11  ;;  %s229_s14 = scalar_lea.vmem [#allocation7], %s2223_s12 }
  0x2c   : > { %p2913_p4 = pnand %p2229_p13, %p251_p3  ;;  %s236_s16 = sshll.u32 %s229_s14, 4  ;;  %s2926_s16 = int_to_ptr.vmem [resolvable:$true] %s236_s16 }
  0x2d   : > { %s226_s15 = scalar_lea.sflag [#allocation8], %s2859_s10  ;;  %s2674_s17 = scalar_lea.hbm %s2922_s13, 4096 }
  0x2e   : > { %p2675_p5 = scmp.ne.s32.totalorder %s2922_s13, %s2674_s17  ;;  %s2679_s11 = scalar_lea.hbm %s3873_s2, 8192 }
  0x2f   : > { %p2680_p10 = scmp.lt.u32.totalorder %s2922_s13, %s3873_s2  ;;  %p2681_p12 = scmp.lt.u32.totalorder %s2679_s11, %s2674_s17 }
  0x30   : > { %p2677_p6 = pnand %p2675_p5, %p2646_p11  ;;  %p2683_p1 = scmp.lt.u32.totalorder %s2674_s17, %s2922_s13 }
  0x31   : > { %p2682_p0 = por %p2681_p12, %p2680_p10 }
  0x32   : > { %p2678_p8 = pneg %p2677_p6 }
  0x33   : > { %p2684_p2 = por %p2683_p1, %p2682_p0 }
  0x35   : > { %p2685_p13 = pnand %p2684_p2, %p2678_p8 }
  0x37   : > { %2688 = shalt.err (!%p2685_p13)
}
  0x38   : > { %s2689_s12 = scalar_lea.vmem %s2926_s16, 4096  ;;  %s2767_s14 = smov [#allocation7]  }
  0x39   : > { %p2690_p3 = scmp.ne.s32.totalorder %s2926_s16, %s2689_s12  ;;  %s2694_s19 = sshll.u32 %s2767_s14, 4  ;;  %s2695_s19 = int_to_ptr.vmem [resolvable:$false] %s2694_s19 }
  0x3a   : > { %s2696_s21 = scalar_lea.vmem %s2695_s19, 8192  ;;  %p2697_p7 = scmp.lt.s32.totalorder %s2926_s16, %s2695_s19 }
  0x3b   : > { %p2692_p5 = pnand %p2690_p3, %p2646_p11  ;;  %p2698_p10 = scmp.lt.s32.totalorder %s2696_s21, %s2689_s12 }
  0x3d   : > { %p2693_p6 = pneg %p2692_p5  ;;  %p2699_p12 = por %p2698_p10, %p2697_p7 }
  0x3f   : > { %p2700_p0 = pnand %p2699_p12, %p2693_p6 }
  0x41   : > { %2703 = shalt.err (!%p2700_p0)
}
  0x42   : > { %2455 = dma.hbm_to_vmem [thread:$0]  (!%p2874_p9), %s2922_s13, 4096, %s2926_s16, %s226_s15, %s2765_s20, %s2765_s20, %s2766_s27  }
  0x43   : > { %255 = sbr.rel (%p2913_p4) target bundleno = 2473 (0x9a9), region = 40 }
  0x4a   : > { %s257_s17 = sand.u32 1, %s2746_s22   ;;  %p3898_p7 = scmp.ne.s32.totalorder %s3895_s8, 0 }
  0x4b   : > { %s2230_s11 = sshll.u32 %s257_s17, 8  ;;  %s258_s30 = scalar_lea.sflag [#allocation6], %s257_s17 }
  0x4c   : > { %s2960_s7 = scalar_lea.vmem [#allocation5], %s2230_s11 }
  0x4d   : > { %2729 = dma.done.wait (%p3898_p7), %s258_s30, 4096  }
  0x4e   : > { %2731 = vsyncadd (%p3898_p7), %s258_s30, 4294963200  ;;  %s267_s10 = scalar_lea.sflag [#allocation8], %s257_s17  ;;  %s2966_s18 = scalar_lea.vmem [#allocation7], %s2230_s11 }
  0x4f   : > { %2733 = dma.done.wait (%p3898_p7), %s267_s10, 4096  }
  0x50   : > { %2735 = vsyncadd (%p3898_p7), %s267_s10, 4294963200  ;;  %p305_p9 = scmp.lt.s32.totalorder %s2754_s24, 1  ;;  %p2233_p11 = scmp.ne.s32.totalorder %s2754_s24, 0 }
  0x51   : > { %v353_v0 = vld [vmem:[%s3871_s0] sm:$0xff] (!%p2233_p11)  ;;  %v355_v1 = vld [vmem:[%s3871_s0 + $0x8] sm:$0xff] (!%p2233_p11)  ;;  %v357_v2 = vld [vmem:[%s3871_s0 + $0x10] sm:$0xff] (!%p2233_p11) }
  0x52   : > { %s306_s20 = scalar_select %p305_p9, %s2754_s24, 1 }
  0x53   : > { %317 = sbr.rel (%p2233_p11) target bundleno = 91 (0x5b), region = 52  ;;  %354 = vst [vmem:[#allocation2] sm:$0xff] (!%p2233_p11), %v353_v0  ;;  %356 = vst [vmem:[#allocation2 + $0x8] sm:$0xff] (!%p2233_p11), %v355_v1  ;;  %v359_v3 = vld [vmem:[%s3871_s0 + $0x18] sm:$0xff] (!%p2233_p11) }
  0x54   : > { %s2232_s27 = sshll.u32 %s306_s20, 2  ;;  %358 = vst [vmem:[#allocation2 + $0x10] sm:$0xff] (!%p2233_p11), %v357_v2  ;;  %360 = vst [vmem:[#allocation2 + $0x18] sm:$0xff] (!%p2233_p11), %v359_v3 }
  0x55   : > { %s2977_s16 = scalar_lea.vmem %s3874_s3, %s2232_s27 }
  0x5a   : > { %368 = vsyncadd [#allocation4], 512 }
  0x5b PF: > { %v2993_v4 = vld [vmem:[%s2960_s7] sm:$0xff]  ;;  %v2996_v5 = vld [vmem:[%s2960_s7 + $0x8] sm:$0xff]  ;;  %v2999_v6 = vld [vmem:[%s2960_s7 + $0x10] sm:$0xff]  ;;  %p2457_p4 = scmp.eq.s32.totalorder %s2754_s24, 0 }
  0x5c   : > { %v3003_v7 = vld [vmem:[%s2960_s7 + $0x18] sm:$0xff]  ;;  %v3006_v8 = vld [vmem:[%s2960_s7 + $0x20] sm:$0xff]  ;;  %v3009_v9 = vld [vmem:[%s2960_s7 + $0x28] sm:$0xff] }
  0x5d   : > { %v3012_v10 = vld [vmem:[%s2960_s7 + $0x30] sm:$0xff]  ;;  %v3015_v11 = vld [vmem:[%s2960_s7 + $0x38] sm:$0xff]  ;;  %v3018_v12 = vld [vmem:[%s2960_s7 + $0x40] sm:$0xff] }
  0x5e   : > { %v3021_v13 = vld [vmem:[%s2960_s7 + $0x48] sm:$0xff]  ;;  %v3024_v14 = vld [vmem:[%s2960_s7 + $0x50] sm:$0xff]  ;;  %v3027_v15 = vld [vmem:[%s2960_s7 + $0x58] sm:$0xff] }
  0x5f   : > { %v3030_v16 = vld [vmem:[%s2960_s7 + $0x60] sm:$0xff]  ;;  %v3033_v17 = vld [vmem:[%s2960_s7 + $0x68] sm:$0xff]  ;;  %v3036_v18 = vld [vmem:[%s2960_s7 + $0x70] sm:$0xff] }
  0x60   : > { %v3039_v19 = vld [vmem:[%s2960_s7 + $0x78] sm:$0xff]  ;;  %v3042_v20 = vld [vmem:[%s2960_s7 + $0x80] sm:$0xff]  ;;  %v3045_v21 = vld [vmem:[%s2960_s7 + $0x88] sm:$0xff] }
  0x61   : > { %v3048_v22 = vld [vmem:[%s2960_s7 + $0x90] sm:$0xff]  ;;  %v3051_v23 = vld [vmem:[%s2960_s7 + $0x98] sm:$0xff]  ;;  %v3054_v24 = vld [vmem:[%s2960_s7 + $0xa0] sm:$0xff] }
  0x62   : > { %v3057_v25 = vld [vmem:[%s2960_s7 + $0xa8] sm:$0xff]  ;;  %v3060_v26 = vld [vmem:[%s2960_s7 + $0xb0] sm:$0xff]  ;;  %v3063_v27 = vld [vmem:[%s2960_s7 + $0xb8] sm:$0xff] }
  0x63   : > { %v3066_v28 = vld [vmem:[%s2960_s7 + $0xc0] sm:$0xff]  ;;  %v3069_v29 = vld [vmem:[%s2960_s7 + $0xc8] sm:$0xff]  ;;  %v3072_v30 = vld [vmem:[%s2960_s7 + $0xd0] sm:$0xff] }
  0x64   : > { %v3075_v31 = vld [vmem:[%s2960_s7 + $0xd8] sm:$0xff]  ;;  %v3078_v32 = vld [vmem:[%s2960_s7 + $0xe0] sm:$0xff]  ;;  %v3081_v33 = vld [vmem:[%s2960_s7 + $0xe8] sm:$0xff] }
  0x65   : > { %v3084_v34 = vld [vmem:[%s2960_s7 + $0xf0] sm:$0xff]  ;;  %v3087_v35 = vld [vmem:[%s2960_s7 + $0xf8] sm:$0xff]  ;;  %v3090_v36 = vld [vmem:[%s2966_s18] sm:$0xff] }
  0x66   : > { %v3093_v37 = vld [vmem:[%s2966_s18 + $0x8] sm:$0xff]  ;;  %v3096_v38 = vld [vmem:[%s2966_s18 + $0x10] sm:$0xff]  ;;  %v3099_v39 = vld [vmem:[%s2966_s18 + $0x18] sm:$0xff] }
  0x67   : > { %v3102_v40 = vld [vmem:[%s2966_s18 + $0x20] sm:$0xff]  ;;  %v3105_v41 = vld [vmem:[%s2966_s18 + $0x28] sm:$0xff]  ;;  %v3108_v42 = vld [vmem:[%s2966_s18 + $0x30] sm:$0xff] }
  0x68   : > { %v3111_v43 = vld [vmem:[%s2966_s18 + $0x38] sm:$0xff]  ;;  %v3114_v44 = vld [vmem:[%s2966_s18 + $0x40] sm:$0xff]  ;;  %v3117_v45 = vld [vmem:[%s2966_s18 + $0x48] sm:$0xff] }
  0x69   : > { %v3120_v46 = vld [vmem:[%s2966_s18 + $0x50] sm:$0xff]  ;;  %v3123_v47 = vld [vmem:[%s2966_s18 + $0x58] sm:$0xff]  ;;  %v3126_v48 = vld [vmem:[%s2966_s18 + $0x60] sm:$0xff] }
  0x6a   : > { %v3129_v49 = vld [vmem:[%s2966_s18 + $0x68] sm:$0xff]  ;;  %v3132_v50 = vld [vmem:[%s2966_s18 + $0x70] sm:$0xff]  ;;  %v3135_v51 = vld [vmem:[%s2966_s18 + $0x78] sm:$0xff] }
  0x6b   : > { %v3138_v52 = vld [vmem:[%s2966_s18 + $0x80] sm:$0xff]  ;;  %v3141_v53 = vld [vmem:[%s2966_s18 + $0x88] sm:$0xff]  ;;  %v3144_v54 = vld [vmem:[%s2966_s18 + $0x90] sm:$0xff] }
  0x6c   : > { %v3147_v55 = vld [vmem:[%s2966_s18 + $0x98] sm:$0xff]  ;;  %v3150_v56 = vld [vmem:[%s2966_s18 + $0xa0] sm:$0xff]  ;;  %v3153_v57 = vld [vmem:[%s2966_s18 + $0xa8] sm:$0xff] }
  0x6d   : > { %3899 = vst [vmem:[#allocation13_spill] sm:$0xff] %v3153_v57  ;;  %v3156_v58 = vld [vmem:[%s2966_s18 + $0xb0] sm:$0xff]  ;;  %v3159_v59 = vld [vmem:[%s2966_s18 + $0xb8] sm:$0xff]  ;;  %v3162_v60 = vld [vmem:[%s2966_s18 + $0xc0] sm:$0xff] }
  0x6e   : > { %3900 = vst [vmem:[#allocation14_spill] sm:$0xff] %v3159_v59  ;;  %3901 = vst [vmem:[#allocation15_spill] sm:$0xff] %v3162_v60  ;;  %v3165_v61 = vld [vmem:[%s2966_s18 + $0xc8] sm:$0xff]  ;;  %v3168_v62 = vld [vmem:[%s2966_s18 + $0xd0] sm:$0xff]  ;;  %v2240_v59 = vcombine.high %v2993_v4, %v2999_v6  ;;  %v2239_v60 = vcombine.low %v2993_v4, %v2999_v6 }
  0x6f   : > { %3902 = vst [vmem:[#allocation16_spill] sm:$0xff] %v3165_v61  ;;  %v3171_v63 = vld [vmem:[%s2966_s18 + $0xd8] sm:$0xff]  ;;  %v3174_v0 = vld [vmem:[%s2966_s18 + $0xe0] sm:$0xff]  ;;  %v3177_v1 = vld [vmem:[%s2966_s18 + $0xe8] sm:$0xff]  ;;  %v2242_v61 = vcombine.high %v2996_v5, %v3003_v7 }
  0x70   : > { %3903 = vst [vmem:[#allocation17_spill] sm:$0xff] %v3174_v0  ;;  %3904 = vst [vmem:[#allocation18_spill] sm:$0xff] %v3177_v1  ;;  %v3180_v2 = vld [vmem:[%s2966_s18 + $0xf0] sm:$0xff]  ;;  %v3183_v3 = vld [vmem:[%s2966_s18 + $0xf8] sm:$0xff]  ;;  %v2241_v0 = vcombine.low %v2996_v5, %v3003_v7 }
  0x71   : > { %3905 = vst [vmem:[#allocation19_spill] sm:$0xff] %v3183_v3  ;;  %v3186_v57 = vld [vmem:[%s2977_s16] sm:$0xf] }
  0x72   : > { %3906 = vst [vmem:[#allocation20_spill] sm:$0xff] %v3186_v57 }
  0x73   : > { %2737 = dma.done.wait (%p2457_p4), [#allocation4], 512 }
  0x74   : > { %2739 = vsyncadd (%p2457_p4), [#allocation4], 4294966784  ;;  %v2244_v57 = vcombine.high %v3006_v8, %v3012_v10  ;;  %v2246_v1 = vcombine.high %v3009_v9, %v3015_v11  ;;  %655 = vmatprep.subr.bf16.mxu0 %v2240_v59  ;;  %728 = vmatprep.subr.bf16.mxu1 %v2242_v61  ;;  %v2243_v4 = vcombine.low %v3006_v8, %v3012_v10  ;;  %v3887_v3 = vmov 0   ;;  %v3908_v61 = vld [vmem:[#allocation13_spill] sm:$0xff]  ;;  %p2343_p8 = scmp.ne.s32.totalorder %s2754_s24, 1 }
  0x75   : > { %656 = vmatpush1.bf16.msra.mxu0 %v2239_v60  ;;  %729 = vmatpush1.bf16.msra.mxu1 %v2241_v0  ;;  %v2245_v5 = vcombine.low %v3009_v9, %v3015_v11  ;;  %v2248_v6 = vcombine.high %v3018_v12, %v3024_v14  ;;  %v2250_v7 = vcombine.high %v3021_v13, %v3027_v15  ;;  %v3907_v60 = vld [vmem:[#allocation14_spill] sm:$0xff]  ;;  %vm2770_vm0 = vmmov (!%p2343_p8), 0  }
  0x76   : > { %657 = vmatprep.subr.bf16.mxu0 %v2244_v57  ;;  %730 = vmatprep.subr.bf16.mxu1 %v2246_v1  ;;  %v2247_v8 = vcombine.low %v3018_v12, %v3024_v14  ;;  %v2249_v9 = vcombine.low %v3021_v13, %v3027_v15  ;;  %v2252_v10 = vcombine.high %v3030_v16, %v3036_v18  ;;  %v3910_v1 = vld [vmem:[#allocation16_spill] sm:$0xff]  ;;  %vm2097_vm1 = vcmask (!%p2343_p8), 31744  }
  0x77   : > { %687 = vmatprep.mubr.bf16.mxu0 %v3887_v3  ;;  %760 = vmatprep.mubr.bf16.mxu1 %v3887_v3  ;;  %v2254_v11 = vcombine.high %v3033_v17, %v3039_v19  ;;  %v2251_v57 = vcombine.low %v3030_v16, %v3036_v18  ;;  %v2253_v59 = vcombine.low %v3033_v17, %v3039_v19 }
  0x78   : > { %v2256_v12 = vcombine.high %v3042_v20, %v3048_v22  ;;  %v2258_v13 = vcombine.high %v3045_v21, %v3051_v23  ;;  %v2255_v14 = vcombine.low %v3042_v20, %v3048_v22  ;;  %v2257_v15 = vcombine.low %v3045_v21, %v3051_v23 }
  0x79   : > { %658 = vmatpush1.bf16.msra.mxu0 %v2243_v4  ;;  %731 = vmatpush1.bf16.msra.mxu1 %v2245_v5  ;;  %v2260_v16 = vcombine.high %v3054_v24, %v3060_v26  ;;  %v2262_v17 = vcombine.high %v3057_v25, %v3063_v27  ;;  %v2259_v18 = vcombine.low %v3054_v24, %v3060_v26 }
  0x7a   : > { %659 = vmatprep.subr.bf16.mxu0 %v2248_v6  ;;  %732 = vmatprep.subr.bf16.mxu1 %v2250_v7  ;;  %v2261_v19 = vcombine.low %v3057_v25, %v3063_v27  ;;  %v2264_v20 = vcombine.high %v3066_v28, %v3072_v30  ;;  %v2266_v21 = vcombine.high %v3069_v29, %v3075_v31  ;;  %v3911_v6 = vld [vmem:[#allocation17_spill] sm:$0xff] }
  0x7b   : > { %v2263_v22 = vcombine.low %v3066_v28, %v3072_v30  ;;  %v2265_v23 = vcombine.low %v3069_v29, %v3075_v31  ;;  %v2268_v24 = vcombine.high %v3078_v32, %v3084_v34  ;;  %v2270_v25 = vcombine.high %v3081_v33, %v3087_v35  ;;  %v2512_v30 = vld [vmem:[#allocation2] sm:$0xff]  }
  0x7c   : > { %v2267_v26 = vcombine.low %v3078_v32, %v3084_v34  ;;  %v2269_v27 = vcombine.low %v3081_v33, %v3087_v35  ;;  %v3260_v28 = vcombine.high %v3090_v36, %v3096_v38  ;;  %v3264_v29 = vcombine.high %v3093_v37, %v3099_v39 }
  0x7d   : > { %660 = vmatpush1.bf16.msra.mxu0 %v2247_v8  ;;  %733 = vmatpush1.bf16.msra.mxu1 %v2249_v9  ;;  %v3268_v31 = vcombine.low %v3090_v36, %v3096_v38  ;;  %v3272_v32 = vcombine.low %v3093_v37, %v3099_v39  ;;  %v3278_v33 = vcombine.high %v3102_v40, %v3108_v42  ;;  %v2513_v39 = vld [vmem:[#allocation2 + $0x8] sm:$0xff]   ;;  %v3912_v8 = vld [vmem:[#allocation19_spill] sm:$0xff] }
  0x7e   : > { %661 = vmatprep.subr.bf16.mxu0 %v2252_v10  ;;  %734 = vmatprep.subr.bf16.mxu1 %v2254_v11  ;;  %v3282_v34 = vcombine.high %v3105_v41, %v3111_v43  ;;  %v3288_v35 = vcombine.low %v3102_v40, %v3108_v42  ;;  %v3292_v36 = vcombine.low %v3105_v41, %v3111_v43  ;;  %v3913_v9 = vld [vmem:[#allocation18_spill] sm:$0xff] }
  0x7f   : > { %v3298_v37 = vcombine.high %v3114_v44, %v3120_v46  ;;  %v3302_v38 = vcombine.high %v3117_v45, %v3123_v47  ;;  %v3310_v40 = vcombine.low %v3114_v44, %v3120_v46  ;;  %v3314_v41 = vcombine.low %v3117_v45, %v3123_v47 }
  0x80   : > { %v3320_v42 = vcombine.high %v3126_v48, %v3132_v50  ;;  %v3324_v43 = vcombine.high %v3129_v49, %v3135_v51  ;;  %v3330_v44 = vcombine.low %v3126_v48, %v3132_v50  ;;  %v3334_v45 = vcombine.low %v3129_v49, %v3135_v51  ;;  %v2514_v48 = vld [vmem:[#allocation2 + $0x10] sm:$0xff]  }
  0x81   : > { %662 = vmatpush1.bf16.msra.mxu0 %v2251_v57  ;;  %735 = vmatpush1.bf16.msra.mxu1 %v2253_v59  ;;  %v3340_v46 = vcombine.high %v3138_v52, %v3144_v54  ;;  %v3344_v47 = vcombine.high %v3141_v53, %v3147_v55  ;;  %v3352_v49 = vcombine.low %v3138_v52, %v3144_v54  ;;  %v3909_v54 = vld [vmem:[#allocation15_spill] sm:$0xff] }
  0x82   : > { %663 = vmatprep.subr.bf16.mxu0 %v2256_v12  ;;  %736 = vmatprep.subr.bf16.mxu1 %v2258_v13  ;;  %v3356_v50 = vcombine.low %v3141_v53, %v3147_v55  ;;  %v3362_v51 = vcombine.high %v3150_v56, %v3156_v58  ;;  %v3366_v0 = vcombine.high %v3908_v61, %v3907_v60 }
  0x83   : > { %v3372_v52 = vcombine.low %v3150_v56, %v3156_v58  ;;  %v3376_v53 = vcombine.low %v3908_v61, %v3907_v60  ;;  %v3382_v55 = vcombine.high %v3909_v54, %v3168_v62  ;;  %v3386_v4 = vcombine.high %v3910_v1, %v3171_v63  ;;  %v2515_v56 = vld [vmem:[#allocation2 + $0x18] sm:$0xff]  }
  0x84   : > { %v3394_v58 = vcombine.low %v3909_v54, %v3168_v62  ;;  %v3398_v5 = vcombine.low %v3910_v1, %v3171_v63  ;;  %v3404_v7 = vcombine.high %v3911_v6, %v3180_v2  ;;  %v3408_v10 = vcombine.high %v3913_v9, %v3912_v8 }
  0x85   : > { %664 = vmatpush1.bf16.msra.mxu0 %v2255_v14  ;;  %737 = vmatpush1.bf16.msra.mxu1 %v2257_v15  ;;  %v3414_v62 = vcombine.low %v3911_v6, %v3180_v2  ;;  %v3418_v63 = vcombine.low %v3913_v9, %v3912_v8  ;;  %v451_v2 = vlaneseq  ;;  %v3914_v14 = vld [vmem:[#allocation20_spill] sm:$0xff] }
  0x86   : > { %665 = vmatprep.subr.bf16.mxu0 %v2260_v16  ;;  %738 = vmatprep.subr.bf16.mxu1 %v2262_v17 }
  0x87   : > { %v452_v11 = vshrl.u32 %v451_v2, 7 }
  0x89   : > { %666 = vmatpush1.bf16.msra.mxu0 %v2259_v18  ;;  %739 = vmatpush1.bf16.msra.mxu1 %v2261_v19  ;;  %v453_v57 = vsub.s32 0, %v452_v11  ;;  %v461_v59 = vsub.s32 2, %v452_v11  ;;  %v457_v12 = vsub.s32 1, %v452_v11  ;;  %v465_v13 = vsub.s32 3, %v452_v11 }
  0x8a   : > { %667 = vmatprep.subr.bf16.mxu0 %v2264_v20  ;;  %740 = vmatprep.subr.bf16.mxu1 %v2266_v21 }
  0x8b   : > { %v3465_v15 = vrot.slane %v3914_v14, %v453_v57  ;;  %v3468_v16 = vrot.slane %v3914_v14, %v461_v59  ;;  %v3471_v17 = vrot.slane %v3914_v14, %v457_v12  ;;  %v3474_v18 = vrot.slane %v3914_v14, %v465_v13 }
  0x8d   : > { %668 = vmatpush1.bf16.msra.mxu0 %v2263_v22  ;;  %741 = vmatpush1.bf16.msra.mxu1 %v2265_v23 }
  0x8e   : > { %669 = vmatprep.subr.bf16.mxu0 %v2268_v24  ;;  %742 = vmatprep.subr.bf16.mxu1 %v2270_v25 }
  0x91   : > { %670 = vmatpush1.bf16.msra.mxu0 %v2267_v26  ;;  %743 = vmatpush1.bf16.msra.mxu1 %v2269_v27 }
  0x92   : > { %1079 = vmatprep.subr.bf16.mxu0 %v3260_v28  ;;  %1120 = vmatprep.subr.bf16.mxu1 %v3264_v29 }
  0x94   : > { %688 = vmatmul.mubr.bf16.vlgmr.msra.gmra.mrb[0].mxu0 %v2512_v30  ;;  %761 = vmatmul.mubr.bf16.vlgmr.msra.gmra.mrb[0].mxu1 %v2512_v30 }
  0x95   : > { %1080 = vmatpush1.bf16.msra.mxu0 %v3268_v31  ;;  %1121 = vmatpush1.bf16.msra.mxu1 %v3272_v32 }
  0x96   : > { %1081 = vmatprep.subr.bf16.mxu0 %v3278_v33  ;;  %1122 = vmatprep.subr.bf16.mxu1 %v3282_v34 }
  0x97   : > { %697 = vmatprep.mubr.bf16.mxu0 %v3887_v3  ;;  %770 = vmatprep.mubr.bf16.mxu1 %v3887_v3 }
  0x99   : > { %1082 = vmatpush1.bf16.msra.mxu0 %v3288_v35  ;;  %1123 = vmatpush1.bf16.msra.mxu1 %v3292_v36 }
  0x9a   : > { %1083 = vmatprep.subr.bf16.mxu0 %v3298_v37  ;;  %1124 = vmatprep.subr.bf16.mxu1 %v3302_v38 }
  0x9c   : > { %698 = vmatmul.mubr.bf16.gmra.mrb[4].mxu0 %v2513_v39  ;;  %771 = vmatmul.mubr.bf16.gmra.mrb[4].mxu1 %v2513_v39 }
  0x9d   : > { %1084 = vmatpush1.bf16.msra.mxu0 %v3310_v40  ;;  %1125 = vmatpush1.bf16.msra.mxu1 %v3314_v41 }
  0x9e   : > { %1085 = vmatprep.subr.bf16.mxu0 %v3320_v42  ;;  %1126 = vmatprep.subr.bf16.mxu1 %v3324_v43 }
  0x9f   : > { %707 = vmatprep.mubr.bf16.mxu0 %v3887_v3  ;;  %780 = vmatprep.mubr.bf16.mxu1 %v3887_v3 }
  0xa1   : > { %1086 = vmatpush1.bf16.msra.mxu0 %v3330_v44  ;;  %1127 = vmatpush1.bf16.msra.mxu1 %v3334_v45 }
  0xa2   : > { %1087 = vmatprep.subr.bf16.mxu0 %v3340_v46  ;;  %1128 = vmatprep.subr.bf16.mxu1 %v3344_v47 }
  0xa4   : > { %708 = vmatmul.mubr.bf16.gmra.mrb[8].mxu0 %v2514_v48  ;;  %781 = vmatmul.mubr.bf16.gmra.mrb[8].mxu1 %v2514_v48 }
  0xa5   : > { %1088 = vmatpush1.bf16.msra.mxu0 %v3352_v49  ;;  %1129 = vmatpush1.bf16.msra.mxu1 %v3356_v50 }
  0xa6   : > { %1089 = vmatprep.subr.bf16.mxu0 %v3362_v51  ;;  %1130 = vmatprep.subr.bf16.mxu1 %v3366_v0 }
  0xa7   : > { %717 = vmatprep.mubr.bf16.mxu0 %v3887_v3  ;;  %790 = vmatprep.mubr.bf16.mxu1 %v3887_v3 }
  0xa9   : > { %1090 = vmatpush1.bf16.msra.mxu0 %v3372_v52  ;;  %1131 = vmatpush1.bf16.msra.mxu1 %v3376_v53 }
  0xaa   : > { %1091 = vmatprep.subr.bf16.mxu0 %v3382_v55  ;;  %1132 = vmatprep.subr.bf16.mxu1 %v3386_v4 }
  0xac   : > { %718 = vmatmul.mubr.bf16.gmra.mrb[12].mxu0 %v2515_v56  ;;  %791 = vmatmul.mubr.bf16.gmra.mrb[12].mxu1 %v2515_v56 }
  0xad   : > { %1092 = vmatpush1.bf16.msra.mxu0 %v3394_v58  ;;  %1133 = vmatpush1.bf16.msra.mxu1 %v3398_v5 }
  0xae   : > { %1093 = vmatprep.subr.bf16.mxu0 %v3404_v7  ;;  %1134 = vmatprep.subr.bf16.mxu1 %v3408_v10 }
  0xaf   : > { %1111 = vmatprep.mubr.bf16.mxu0 %v3887_v3  ;;  %1152 = vmatprep.mubr.bf16.mxu1 %v3887_v3 }
  0xb1   : > { %1094 = vmatpush1.bf16.msra.mxu0 %v3414_v62  ;;  %1135 = vmatpush1.bf16.msra.mxu1 %v3418_v63 }
  0xb2   : > { %1194 = vmatprep.subr.bf16.mxu0 %v3260_v28  ;;  %1235 = vmatprep.subr.bf16.mxu1 %v3264_v29 }
  0xb4   : > { %1112 = vmatmul.mubr.bf16.vlgmr.msra.gmra.mrb[16].mxu0 %v3887_v3  ;;  %1153 = vmatmul.mubr.bf16.vlgmr.msra.gmra.mrb[16].mxu1 %v3887_v3 }
  0xb5   : > { %1195 = vmatpush1.bf16.msra.mxu0 %v3268_v31  ;;  %1236 = vmatpush1.bf16.msra.mxu1 %v3272_v32 }
  0xb6   : > { %1196 = vmatprep.subr.bf16.mxu0 %v3278_v33  ;;  %1237 = vmatprep.subr.bf16.mxu1 %v3282_v34 }
  0xb7   : > { %1226 = vmatprep.mubr.bf16.mxu0 %v3887_v3  ;;  %1267 = vmatprep.mubr.bf16.mxu1 %v3887_v3 }
  0xb9   : > { %1197 = vmatpush1.bf16.msra.mxu0 %v3288_v35  ;;  %1238 = vmatpush1.bf16.msra.mxu1 %v3292_v36 }
  0xba   : > { %1198 = vmatprep.subr.bf16.mxu0 %v3298_v37  ;;  %1239 = vmatprep.subr.bf16.mxu1 %v3302_v38 }
  0xbd   : > { %1199 = vmatpush1.bf16.msra.mxu0 %v3310_v40  ;;  %1240 = vmatpush1.bf16.msra.mxu1 %v3314_v41 }
  0xbe   : > { %1200 = vmatprep.subr.bf16.mxu0 %v3320_v42  ;;  %1241 = vmatprep.subr.bf16.mxu1 %v3324_v43 }
  0xc1   : > { %1201 = vmatpush1.bf16.msra.mxu0 %v3330_v44  ;;  %1242 = vmatpush1.bf16.msra.mxu1 %v3334_v45 }
  0xc2   : > { %1202 = vmatprep.subr.bf16.mxu0 %v3340_v46  ;;  %1243 = vmatprep.subr.bf16.mxu1 %v3344_v47 }
  0xc5   : > { %1203 = vmatpush1.bf16.msra.mxu0 %v3352_v49  ;;  %1244 = vmatpush1.bf16.msra.mxu1 %v3356_v50 }
  0xc6   : > { %1204 = vmatprep.subr.bf16.mxu0 %v3362_v51  ;;  %1245 = vmatprep.subr.bf16.mxu1 %v3366_v0 }
  0xc9   : > { %1205 = vmatpush1.bf16.msra.mxu0 %v3372_v52  ;;  %1246 = vmatpush1.bf16.msra.mxu1 %v3376_v53 }
  0xca   : > { %1206 = vmatprep.subr.bf16.mxu0 %v3382_v55  ;;  %1247 = vmatprep.subr.bf16.mxu1 %v3386_v4 }
  0xcd   : > { %1207 = vmatpush1.bf16.msra.mxu0 %v3394_v58  ;;  %1248 = vmatpush1.bf16.msra.mxu1 %v3398_v5 }
  0xce   : > { %1208 = vmatprep.subr.bf16.mxu0 %v3404_v7  ;;  %1249 = vmatprep.subr.bf16.mxu1 %v3408_v10 }
  0xd1   : > { %1209 = vmatpush1.bf16.msra.mxu0 %v3414_v62  ;;  %1250 = vmatpush1.bf16.msra.mxu1 %v3418_v63 }
  0xd2   : > { %1310 = vmatprep.subr.bf16.mxu0 %v3260_v28  ;;  %1351 = vmatprep.subr.bf16.mxu1 %v3264_v29 }
 0x167   : > { %v689_v19 = vpop.f32.mrb[0].mxu0  ;;  %v762_v20 = vpop.f32.mrb[0].mxu1 }
 0x168   : > { %v690_v21 = vadd.f32 %v689_v19, %v3465_v15  ;;  %v691_v22 = vpop.f32.mrb[1].mxu0  ;;  %v763_v23 = vadd.f32 %v762_v20, %v3468_v16  ;;  %v764_v24 = vpop.f32.mrb[1].mxu1 }
 0x169   : > { %v692_v25 = vadd.f32 %v691_v22, %v3471_v17  ;;  %v693_v26 = vpop.f32.mrb[2].mxu0  ;;  %v765_v27 = vadd.f32 %v764_v24, %v3474_v18  ;;  %v766_v30 = vpop.f32.mrb[2].mxu1 }
 0x16a   : > { %v694_v39 = vadd.f32 %v693_v26, %v3465_v15  ;;  %v695_v48 = vpop.f32.mrb[3].mxu0  ;;  %v767_v60 = vadd.f32 %v766_v30, %v3468_v16  ;;  %v768_v61 = vpop.f32.mrb[3].mxu1 }
 0x16b   : > { %v3482_v54 = vpack.c.bf16 %v692_v25, %v690_v21  ;;  %v696_v1 = vadd.f32 %v695_v48, %v3471_v17  ;;  %v3485_v56 = vpack.c.bf16 %v765_v27, %v763_v23  ;;  %v769_v6 = vadd.f32 %v768_v61, %v3474_v18 }
 0x16d   : > { %v3488_v8 = vpack.c.bf16 %v696_v1, %v694_v39  ;;  %v3490_v9 = vpack.c.bf16 %v769_v6, %v767_v60 }
 0x16f   : > { %v699_v2 = vpop.f32.mrb[4].mxu0  ;;  %v772_v11 = vpop.f32.mrb[4].mxu1 }
 0x170   : > { %v700_v57 = vadd.f32 %v699_v2, %v3465_v15  ;;  %v701_v59 = vpop.f32.mrb[5].mxu0  ;;  %v773_v12 = vadd.f32 %v772_v11, %v3468_v16  ;;  %v774_v13 = vpop.f32.mrb[5].mxu1 }
 0x171   : > { %v702_v14 = vadd.f32 %v701_v59, %v3471_v17  ;;  %v703_v19 = vpop.f32.mrb[6].mxu0  ;;  %v775_v20 = vadd.f32 %v774_v13, %v3474_v18  ;;  %v776_v21 = vpop.f32.mrb[6].mxu1 }
 0x172   : > { %v704_v22 = vadd.f32 %v703_v19, %v3465_v15  ;;  %v705_v23 = vpop.f32.mrb[7].mxu0  ;;  %v777_v24 = vadd.f32 %v776_v21, %v3468_v16  ;;  %v778_v25 = vpop.f32.mrb[7].mxu1 }
 0x173   : > { %v3498_v26 = vpack.c.bf16 %v702_v14, %v700_v57  ;;  %v706_v27 = vadd.f32 %v705_v23, %v3471_v17  ;;  %v3501_v30 = vpack.c.bf16 %v775_v20, %v773_v12  ;;  %v779_v39 = vadd.f32 %v778_v25, %v3474_v18 }
 0x175   : > { %v3504_v48 = vpack.c.bf16 %v706_v27, %v704_v22  ;;  %v3506_v60 = vpack.c.bf16 %v779_v39, %v777_v24 }
 0x177   : > { %v709_v61 = vpop.f32.mrb[8].mxu0  ;;  %v782_v1 = vpop.f32.mrb[8].mxu1 }
 0x178   : > { %v710_v6 = vadd.f32 %v709_v61, %v3465_v15  ;;  %v711_v2 = vpop.f32.mrb[9].mxu0  ;;  %v783_v11 = vadd.f32 %v782_v1, %v3468_v16  ;;  %v784_v59 = vpop.f32.mrb[9].mxu1 }
 0x179   : > { %v712_v57 = vadd.f32 %v711_v2, %v3471_v17  ;;  %v713_v13 = vpop.f32.mrb[10].mxu0  ;;  %v785_v12 = vadd.f32 %v784_v59, %v3474_v18  ;;  %v786_v14 = vpop.f32.mrb[10].mxu1 }
 0x17a   : > { %v714_v19 = vadd.f32 %v713_v13, %v3465_v15  ;;  %v715_v20 = vpop.f32.mrb[11].mxu0  ;;  %v787_v21 = vadd.f32 %v786_v14, %v3468_v16  ;;  %v788_v22 = vpop.f32.mrb[11].mxu1 }
 0x17b   : > { %v3514_v23 = vpack.c.bf16 %v712_v57, %v710_v6  ;;  %v716_v24 = vadd.f32 %v715_v20, %v3471_v17  ;;  %v3517_v25 = vpack.c.bf16 %v785_v12, %v783_v11  ;;  %v789_v27 = vadd.f32 %v788_v22, %v3474_v18 }
 0x17d   : > { %v3520_v39 = vpack.c.bf16 %v716_v24, %v714_v19  ;;  %v3522_v61 = vpack.c.bf16 %v789_v27, %v787_v21 }
 0x17f   : > { %3915 = vst [vmem:[#allocation14_spill] sm:$0xff] %v3520_v39  ;;  %3916 = vst [vmem:[#allocation13_spill] sm:$0xff] %v3522_v61  ;;  %v719_v1 = vpop.f32.mrb[12].mxu0  ;;  %v792_v2 = vpop.f32.mrb[12].mxu1 }
 0x180   : > { %v720_v59 = vadd.f32 %v719_v1, %v3465_v15  ;;  %v721_v13 = vpop.f32.mrb[13].mxu0  ;;  %v793_v14 = vadd.f32 %v792_v2, %v3468_v16  ;;  %v794_v3 = vpop.f32.mrb[13].mxu1 }
 0x181   : > { %v722_v6 = vadd.f32 %v721_v13, %v3471_v17  ;;  %v723_v57 = vpop.f32.mrb[14].mxu0  ;;  %v795_v11 = vadd.f32 %v794_v3, %v3474_v18  ;;  %v796_v12 = vpop.f32.mrb[14].mxu1  ;;  %v915_v3 = vunpack.c.l.bf16 %v3482_v54 }
 0x182   : > { %v724_v20 = vadd.f32 %v723_v57, %v3465_v15  ;;  %v725_v19 = vpop.f32.mrb[15].mxu0  ;;  %v797_v21 = vadd.f32 %v796_v12, %v3468_v16  ;;  %v798_v22 = vpop.f32.mrb[15].mxu1  ;;  %v917_v15 = vunpack.c.l.bf16 %v3485_v56  ;;  %v916_v16 = vunpack.c.h.bf16 %v3482_v54 }
 0x183   : > { %v3530_v24 = vpack.c.bf16 %v722_v6, %v720_v59  ;;  %v726_v27 = vadd.f32 %v725_v19, %v3471_v17  ;;  %v3533_v1 = vpack.c.bf16 %v795_v11, %v793_v14  ;;  %v799_v2 = vadd.f32 %v798_v22, %v3474_v18 }
 0x184   : > { %v918_v59 = vunpack.c.h.bf16 %v3485_v56 }
 0x185   : > { %3917 = vst [vmem:[#allocation15_spill] sm:$0xff] %v3533_v1  ;;  %v3536_v61 = vpack.c.bf16 %v726_v27, %v724_v20  ;;  %v3538_v13 = vpack.c.bf16 %v799_v2, %v797_v21 }
 0x187   : > { %3918 = vst [vmem:[#allocation16_spill] sm:$0xff] %v3536_v61  ;;  %3919 = vst [vmem:[#allocation17_spill] sm:$0xff] %v3538_v13  ;;  %v1113_v57 = vpop.f32.mrb[16].mxu0  ;;  %v1154_v39 = vpop.f32.mrb[16].mxu1 }
 0x188   : > { %v1114_v6 = vadd.f32 %v1113_v57, %v915_v3  ;;  %v1155_v17 = vadd.f32 %v1154_v39, %v917_v15  ;;  %v1115_v14 = vpop.f32.mrb[17].mxu0  ;;  %v1156_v11 = vpop.f32.mrb[17].mxu1 }
 0x189   : > { %v1116_v12 = vadd.f32 %v1115_v14, %v916_v16  ;;  %v1157_v18 = vadd.f32 %v1156_v11, %v918_v59  ;;  %v1117_v20 = vpop.f32.mrb[18].mxu0  ;;  %v1158_v19 = vpop.f32.mrb[18].mxu1 }
 0x18a   : > { %v2319_v21 = vmul.f32 -1.442695, %v1114_v6  ;;  %v1118_v22 = vpop.f32.mrb[19].mxu0  ;;  %v1159_v27 = vpop.f32.mrb[19].mxu1  ;;  %v2321_v13 = vmul.f32 -1.442695, %v1155_v17 }
 0x18b   : > { %v2320_v2 = vmul.f32 -1.442695, %v1116_v12  ;;  %v1193_v22 = vunpack.c.h.bf16 %v3490_v9 }
 0x18c   : > { %2516 = vpow2.f32 %v2319_v21  ;;  %v1191_v21 = vunpack.c.h.bf16 %v3488_v8 }
 0x18d   : > { %2518 = vpow2.f32 %v2320_v2 }
 0x18e   : > { %2520 = vtanh.f32 %v1157_v18  ;;  %v1192_v18 = vunpack.c.l.bf16 %v3490_v9 }
 0x18f   : > { %2522 = vpow2.f32 %v2321_v13  ;;  %v1190_v13 = vunpack.c.l.bf16 %v3488_v8 }
 0x196   : > { %v2517_v61 = vpop.eup %2516 }
 0x197   : > { %v1170_v1 = vadd.f32 1.0, %v2517_v61  ;;  %v2519_v54 = vpop.eup %2518 }
 0x198   : > { %v1171_v56 = vadd.f32 1.0, %v2519_v54  ;;  %v2521_v39 = vpop.eup %2520 }
 0x199   : > { %2524 = vrcp.f32 %v1170_v1  ;;  %v2523_v3 = vpop.eup %2522  ;;  %v3920_v1 = vmov 0  }
 0x19a   : > { %2526 = vrcp.f32 %v1171_v56  ;;  %v1172_v59 = vadd.f32 1.0, %v2523_v3 }
 0x19c   : > { %2528 = vrcp.f32 %v1172_v59 }
 0x1a3   : > { %v2525_v15 = vpop.eup %2524 }
 0x1a4   : > { %v1181_v57 = vmul.f32 %v2525_v15, %v2521_v39  ;;  %v2527_v16 = vpop.eup %2526 }
 0x1a5   : > { %v1180_v6 = vmul.f32 0.0, %v2527_v16 }
 0x1a6   : > { %v2529_v17 = vpop.eup %2528 }
 0x1a7   : > { %v3544_v14 = vadd.f32 %v1181_v57, %v1180_v6 }
 0x1a9   : > { %2530 = vtanh.f32 %v3544_v14 }
 0x1b3   : > { %v2531_v61 = vpop.eup %2530 }
 0x1b4   : > { %v1184_v11 = vmul.f32 %v2531_v61, %v2529_v17 }
 0x1b6   : > { %v1185_v12 = vpack.c.bf16 %v1184_v11, %v1184_v11 }
 0x1b8   : > { %1186 = vst [vmem:[#allocation2] sm:$0xf] %v1185_v12  ;;  %1227 = vmatmul.mubr.bf16.vlgmr.msra.gmra.mrb[20].mxu0 %v1185_v12  ;;  %1268 = vmatmul.mubr.bf16.vlgmr.msra.gmra.mrb[20].mxu1 %v1185_v12 }
 0x1b9   : > { %1311 = vmatpush1.bf16.msra.mxu0 %v3268_v31  ;;  %1352 = vmatpush1.bf16.msra.mxu1 %v3272_v32 }
 0x1ba   : > { %1312 = vmatprep.subr.bf16.mxu0 %v3278_v33  ;;  %1353 = vmatprep.subr.bf16.mxu1 %v3282_v34 }
 0x1bb   : > { %1342 = vmatprep.mubr.bf16.mxu0 %v3920_v1  ;;  %1383 = vmatprep.mubr.bf16.mxu1 %v3920_v1 }
 0x1bd   : > { %1313 = vmatpush1.bf16.msra.mxu0 %v3288_v35  ;;  %1354 = vmatpush1.bf16.msra.mxu1 %v3292_v36 }
 0x1be   : > { %1314 = vmatprep.subr.bf16.mxu0 %v3298_v37  ;;  %1355 = vmatprep.subr.bf16.mxu1 %v3302_v38 }
 0x1c1   : > { %1315 = vmatpush1.bf16.msra.mxu0 %v3310_v40  ;;  %1356 = vmatpush1.bf16.msra.mxu1 %v3314_v41 }
 0x1c2   : > { %1316 = vmatprep.subr.bf16.mxu0 %v3320_v42  ;;  %1357 = vmatprep.subr.bf16.mxu1 %v3324_v43 }
 0x1c5   : > { %1317 = vmatpush1.bf16.msra.mxu0 %v3330_v44  ;;  %1358 = vmatpush1.bf16.msra.mxu1 %v3334_v45 }
 0x1c6   : > { %1318 = vmatprep.subr.bf16.mxu0 %v3340_v46  ;;  %1359 = vmatprep.subr.bf16.mxu1 %v3344_v47 }
 0x1c9   : > { %1319 = vmatpush1.bf16.msra.mxu0 %v3352_v49  ;;  %1360 = vmatpush1.bf16.msra.mxu1 %v3356_v50 }
 0x1ca   : > { %1320 = vmatprep.subr.bf16.mxu0 %v3362_v51  ;;  %1361 = vmatprep.subr.bf16.mxu1 %v3366_v0 }
 0x1cd   : > { %1321 = vmatpush1.bf16.msra.mxu0 %v3372_v52  ;;  %1362 = vmatpush1.bf16.msra.mxu1 %v3376_v53 }
 0x1ce   : > { %1322 = vmatprep.subr.bf16.mxu0 %v3382_v55  ;;  %1363 = vmatprep.subr.bf16.mxu1 %v3386_v4 }
 0x1d1   : > { %1323 = vmatpush1.bf16.msra.mxu0 %v3394_v58  ;;  %1364 = vmatpush1.bf16.msra.mxu1 %v3398_v5 }
 0x1d2   : > { %1324 = vmatprep.subr.bf16.mxu0 %v3404_v7  ;;  %1365 = vmatprep.subr.bf16.mxu1 %v3408_v10 }
 0x1d5   : > { %1325 = vmatpush1.bf16.msra.mxu0 %v3414_v62  ;;  %1366 = vmatpush1.bf16.msra.mxu1 %v3418_v63 }
 0x1d6   : > { %1426 = vmatprep.subr.bf16.mxu0 %v3260_v28  ;;  %1467 = vmatprep.subr.bf16.mxu1 %v3264_v29 }
 0x28b   : > { %v1228_v20 = vpop.f32.mrb[20].mxu0  ;;  %v1269_v19 = vpop.f32.mrb[20].mxu1 }
 0x28c   : > { %v1229_v27 = vadd.f32 %v1228_v20, %v1190_v13  ;;  %v1270_v2 = vadd.f32 %v1269_v19, %v1192_v18  ;;  %v1230_v54 = vpop.f32.mrb[21].mxu0  ;;  %v1271_v56 = vpop.f32.mrb[21].mxu1 }
 0x28d   : > { %v1231_v39 = vadd.f32 %v1230_v54, %v1191_v21  ;;  %v1272_v3 = vadd.f32 %v1271_v56, %v1193_v22  ;;  %v1232_v15 = vpop.f32.mrb[22].mxu0  ;;  %v1273_v57 = vpop.f32.mrb[22].mxu1 }
 0x28e   : > { %v2322_v16 = vmul.f32 -1.442695, %v1229_v27  ;;  %v1233_v59 = vpop.f32.mrb[23].mxu0  ;;  %v1274_v6 = vpop.f32.mrb[23].mxu1  ;;  %v2324_v61 = vmul.f32 -1.442695, %v1270_v2  ;;  %v1308_v15 = vunpack.c.l.bf16 %v3501_v30 }
 0x28f   : > { %v2323_v17 = vmul.f32 -1.442695, %v1231_v39  ;;  %v1307_v59 = vunpack.c.h.bf16 %v3498_v26  ;;  %v1309_v6 = vunpack.c.h.bf16 %v3501_v30 }
 0x290   : > { %2532 = vpow2.f32 %v2322_v16 }
 0x291   : > { %2534 = vpow2.f32 %v2323_v17 }
 0x292   : > { %2536 = vtanh.f32 %v1272_v3 }
 0x293   : > { %2538 = vpow2.f32 %v2324_v61 }
 0x29a   : > { %v2533_v11 = vpop.eup %2532 }
 0x29b   : > { %v1285_v12 = vadd.f32 1.0, %v2533_v11  ;;  %v2535_v8 = vpop.eup %2534 }
 0x29c   : > { %v1286_v9 = vadd.f32 1.0, %v2535_v8  ;;  %v2537_v13 = vpop.eup %2536 }
 0x29d   : > { %2540 = vrcp.f32 %v1285_v12  ;;  %v2539_v18 = vpop.eup %2538 }
 0x29e   : > { %2542 = vrcp.f32 %v1286_v9  ;;  %v1287_v22 = vadd.f32 1.0, %v2539_v18 }
 0x2a0   : > { %2544 = vrcp.f32 %v1287_v22 }
 0x2a7   : > { %v2541_v20 = vpop.eup %2540 }
 0x2a8   : > { %v1296_v19 = vmul.f32 %v2541_v20, %v2537_v13  ;;  %v2543_v21 = vpop.eup %2542 }
 0x2a9   : > { %v1295_v27 = vmul.f32 %v2543_v21, %v3544_v14  ;;  %v1306_v14 = vunpack.c.l.bf16 %v3498_v26 }
 0x2aa   : > { %v2545_v2 = vpop.eup %2544 }
 0x2ab   : > { %v3586_v54 = vadd.f32 %v1296_v19, %v1295_v27 }
 0x2ad   : > { %2546 = vtanh.f32 %v3586_v54 }
 0x2b7   : > { %v2547_v56 = vpop.eup %2546 }
 0x2b8   : > { %v1299_v39 = vmul.f32 %v2547_v56, %v2545_v2 }
 0x2ba   : > { %v1300_v3 = vpack.c.bf16 %v1299_v39, %v1299_v39 }
 0x2bc   : > { %1302 = vst [vmem:[#allocation2 + $0x4] sm:$0xf] %v1300_v3  ;;  %1343 = vmatmul.mubr.bf16.vlgmr.msra.gmra.mrb[24].mxu0 %v1300_v3  ;;  %1384 = vmatmul.mubr.bf16.vlgmr.msra.gmra.mrb[24].mxu1 %v1300_v3 }
 0x2bd   : > { %1427 = vmatpush1.bf16.msra.mxu0 %v3268_v31  ;;  %1468 = vmatpush1.bf16.msra.mxu1 %v3272_v32 }
 0x2be   : > { %1428 = vmatprep.subr.bf16.mxu0 %v3278_v33  ;;  %1469 = vmatprep.subr.bf16.mxu1 %v3282_v34 }
 0x2bf   : > { %1458 = vmatprep.mubr.bf16.mxu0 %v3920_v1  ;;  %1499 = vmatprep.mubr.bf16.mxu1 %v3920_v1 }
 0x2c1   : > { %1429 = vmatpush1.bf16.msra.mxu0 %v3288_v35  ;;  %1470 = vmatpush1.bf16.msra.mxu1 %v3292_v36 }
 0x2c2   : > { %1430 = vmatprep.subr.bf16.mxu0 %v3298_v37  ;;  %1471 = vmatprep.subr.bf16.mxu1 %v3302_v38 }
 0x2c5   : > { %1431 = vmatpush1.bf16.msra.mxu0 %v3310_v40  ;;  %1472 = vmatpush1.bf16.msra.mxu1 %v3314_v41 }
 0x2c6   : > { %1432 = vmatprep.subr.bf16.mxu0 %v3320_v42  ;;  %1473 = vmatprep.subr.bf16.mxu1 %v3324_v43 }
 0x2c9   : > { %1433 = vmatpush1.bf16.msra.mxu0 %v3330_v44  ;;  %1474 = vmatpush1.bf16.msra.mxu1 %v3334_v45 }
 0x2ca   : > { %1434 = vmatprep.subr.bf16.mxu0 %v3340_v46  ;;  %1475 = vmatprep.subr.bf16.mxu1 %v3344_v47 }
 0x2cd   : > { %1435 = vmatpush1.bf16.msra.mxu0 %v3352_v49  ;;  %1476 = vmatpush1.bf16.msra.mxu1 %v3356_v50 }
 0x2ce   : > { %1436 = vmatprep.subr.bf16.mxu0 %v3362_v51  ;;  %1477 = vmatprep.subr.bf16.mxu1 %v3366_v0 }
 0x2d1   : > { %1437 = vmatpush1.bf16.msra.mxu0 %v3372_v52  ;;  %1478 = vmatpush1.bf16.msra.mxu1 %v3376_v53 }
 0x2d2   : > { %1438 = vmatprep.subr.bf16.mxu0 %v3382_v55  ;;  %1479 = vmatprep.subr.bf16.mxu1 %v3386_v4 }
 0x2d5   : > { %1439 = vmatpush1.bf16.msra.mxu0 %v3394_v58  ;;  %1480 = vmatpush1.bf16.msra.mxu1 %v3398_v5 }
 0x2d6   : > { %1440 = vmatprep.subr.bf16.mxu0 %v3404_v7  ;;  %1481 = vmatprep.subr.bf16.mxu1 %v3408_v10 }
 0x2d9   : > { %1441 = vmatpush1.bf16.msra.mxu0 %v3414_v62  ;;  %1482 = vmatpush1.bf16.msra.mxu1 %v3418_v63 }
 0x2da   : > { %1542 = vmatprep.subr.bf16.mxu0 %v3260_v28  ;;  %1583 = vmatprep.subr.bf16.mxu1 %v3264_v29 }
 0x38f   : > { %v1344_v57 = vpop.f32.mrb[24].mxu0  ;;  %v1385_v16 = vpop.f32.mrb[24].mxu1 }
 0x390   : > { %v1345_v17 = vadd.f32 %v1344_v57, %v1306_v14  ;;  %v1386_v61 = vadd.f32 %v1385_v16, %v1308_v15  ;;  %v1346_v11 = vpop.f32.mrb[25].mxu0  ;;  %v1387_v12 = vpop.f32.mrb[25].mxu1 }
 0x391   : > { %v1347_v8 = vadd.f32 %v1346_v11, %v1307_v59  ;;  %v1388_v9 = vadd.f32 %v1387_v12, %v1309_v6  ;;  %v1348_v13 = vpop.f32.mrb[26].mxu0  ;;  %v1389_v18 = vpop.f32.mrb[26].mxu1 }
 0x392   : > { %v2325_v20 = vmul.f32 -1.442695, %v1345_v17  ;;  %v1349_v19 = vpop.f32.mrb[27].mxu0  ;;  %v1390_v21 = vpop.f32.mrb[27].mxu1  ;;  %v2327_v27 = vmul.f32 -1.442695, %v1386_v61  ;;  %v1423_v18 = vunpack.c.h.bf16 %v3504_v48 }
 0x393   : > { %v2326_v22 = vmul.f32 -1.442695, %v1347_v8  ;;  %v1424_v8 = vunpack.c.l.bf16 %v3506_v60 }
 0x394   : > { %2548 = vpow2.f32 %v2325_v20  ;;  %v1425_v20 = vunpack.c.h.bf16 %v3506_v60 }
 0x395   : > { %2550 = vpow2.f32 %v2326_v22 }
 0x396   : > { %2552 = vtanh.f32 %v1388_v9 }
 0x397   : > { %2554 = vpow2.f32 %v2327_v27 }
 0x39e   : > { %v2549_v2 = vpop.eup %2548 }
 0x39f   : > { %v1401_v56 = vadd.f32 1.0, %v2549_v2  ;;  %v2551_v26 = vpop.eup %2550 }
 0x3a0   : > { %v1402_v30 = vadd.f32 1.0, %v2551_v26  ;;  %v2553_v39 = vpop.eup %2552 }
 0x3a1   : > { %2556 = vrcp.f32 %v1401_v56  ;;  %v2555_v3 = vpop.eup %2554 }
 0x3a2   : > { %2558 = vrcp.f32 %v1402_v30  ;;  %v1403_v16 = vadd.f32 1.0, %v2555_v3 }
 0x3a4   : > { %2560 = vrcp.f32 %v1403_v16 }
 0x3ab   : > { %v2557_v14 = vpop.eup %2556 }
 0x3ac   : > { %v1412_v15 = vmul.f32 %v2557_v14, %v2553_v39  ;;  %v2559_v57 = vpop.eup %2558 }
 0x3ad   : > { %v1411_v59 = vmul.f32 %v2559_v57, %v3586_v54  ;;  %v1422_v54 = vunpack.c.l.bf16 %v3504_v48 }
 0x3ae   : > { %v2561_v17 = vpop.eup %2560 }
 0x3af   : > { %v3628_v6 = vadd.f32 %v1412_v15, %v1411_v59 }
 0x3b1   : > { %2562 = vtanh.f32 %v3628_v6 }
 0x3bb   : > { %v2563_v61 = vpop.eup %2562 }
 0x3bc   : > { %v1415_v11 = vmul.f32 %v2563_v61, %v2561_v17 }
 0x3be   : > { %v1416_v12 = vpack.c.bf16 %v1415_v11, %v1415_v11 }
 0x3c0   : > { %1418 = vst [vmem:[#allocation2 + $0x8] sm:$0xf] %v1416_v12  ;;  %1459 = vmatmul.mubr.bf16.vlgmr.msra.gmra.mrb[28].mxu0 %v1416_v12  ;;  %1500 = vmatmul.mubr.bf16.vlgmr.msra.gmra.mrb[28].mxu1 %v1416_v12 }
 0x3c1   : > { %1543 = vmatpush1.bf16.msra.mxu0 %v3268_v31  ;;  %1584 = vmatpush1.bf16.msra.mxu1 %v3272_v32 }
 0x3c2   : > { %1544 = vmatprep.subr.bf16.mxu0 %v3278_v33  ;;  %1585 = vmatprep.subr.bf16.mxu1 %v3282_v34 }
 0x3c3   : > { %1574 = vmatprep.mubr.bf16.mxu0 %v3920_v1  ;;  %1615 = vmatprep.mubr.bf16.mxu1 %v3920_v1 }
 0x3c5   : > { %1545 = vmatpush1.bf16.msra.mxu0 %v3288_v35  ;;  %1586 = vmatpush1.bf16.msra.mxu1 %v3292_v36 }
 0x3c6   : > { %1546 = vmatprep.subr.bf16.mxu0 %v3298_v37  ;;  %1587 = vmatprep.subr.bf16.mxu1 %v3302_v38 }
 0x3c9   : > { %1547 = vmatpush1.bf16.msra.mxu0 %v3310_v40  ;;  %1588 = vmatpush1.bf16.msra.mxu1 %v3314_v41 }
 0x3ca   : > { %1548 = vmatprep.subr.bf16.mxu0 %v3320_v42  ;;  %1589 = vmatprep.subr.bf16.mxu1 %v3324_v43 }
 0x3cd   : > { %1549 = vmatpush1.bf16.msra.mxu0 %v3330_v44  ;;  %1590 = vmatpush1.bf16.msra.mxu1 %v3334_v45 }
 0x3ce   : > { %1550 = vmatprep.subr.bf16.mxu0 %v3340_v46  ;;  %1591 = vmatprep.subr.bf16.mxu1 %v3344_v47 }
 0x3d1   : > { %1551 = vmatpush1.bf16.msra.mxu0 %v3352_v49  ;;  %1592 = vmatpush1.bf16.msra.mxu1 %v3356_v50 }
 0x3d2   : > { %1552 = vmatprep.subr.bf16.mxu0 %v3362_v51  ;;  %1593 = vmatprep.subr.bf16.mxu1 %v3366_v0 }
 0x3d5   : > { %1553 = vmatpush1.bf16.msra.mxu0 %v3372_v52  ;;  %1594 = vmatpush1.bf16.msra.mxu1 %v3376_v53 }
 0x3d6   : > { %1554 = vmatprep.subr.bf16.mxu0 %v3382_v55  ;;  %1595 = vmatprep.subr.bf16.mxu1 %v3386_v4 }
 0x3d9   : > { %1555 = vmatpush1.bf16.msra.mxu0 %v3394_v58  ;;  %1596 = vmatpush1.bf16.msra.mxu1 %v3398_v5 }
 0x3da   : > { %1556 = vmatprep.subr.bf16.mxu0 %v3404_v7  ;;  %1597 = vmatprep.subr.bf16.mxu1 %v3408_v10 }
 0x3dd   : > { %1557 = vmatpush1.bf16.msra.mxu0 %v3414_v62  ;;  %1598 = vmatpush1.bf16.msra.mxu1 %v3418_v63 }
 0x3de   : > { %1658 = vmatprep.subr.bf16.mxu0 %v3260_v28  ;;  %1699 = vmatprep.subr.bf16.mxu1 %v3264_v29 }
 0x493   : > { %v1460_v9 = vpop.f32.mrb[28].mxu0  ;;  %v1501_v13 = vpop.f32.mrb[28].mxu1 }
 0x494   : > { %v1461_v19 = vadd.f32 %v1460_v9, %v1422_v54  ;;  %v1502_v21 = vadd.f32 %v1501_v13, %v1424_v8  ;;  %v1462_v22 = vpop.f32.mrb[29].mxu0  ;;  %v1503_v27 = vpop.f32.mrb[29].mxu1 }
 0x495   : > { %v1463_v2 = vadd.f32 %v1462_v22, %v1423_v18  ;;  %v1504_v56 = vadd.f32 %v1503_v27, %v1425_v20  ;;  %v1464_v26 = vpop.f32.mrb[30].mxu0  ;;  %v1505_v30 = vpop.f32.mrb[30].mxu1  ;;  %v1540_v22 = vunpack.c.l.bf16 %v3517_v25 }
 0x496   : > { %v2328_v39 = vmul.f32 -1.442695, %v1461_v19  ;;  %v1465_v3 = vpop.f32.mrb[31].mxu0  ;;  %v1506_v14 = vpop.f32.mrb[31].mxu1  ;;  %v2330_v57 = vmul.f32 -1.442695, %v1502_v21  ;;  %v1541_v26 = vunpack.c.h.bf16 %v3517_v25 }
 0x497   : > { %v2329_v15 = vmul.f32 -1.442695, %v1463_v2 }
 0x498   : > { %2564 = vpow2.f32 %v2328_v39 }
 0x499   : > { %2566 = vpow2.f32 %v2329_v15 }
 0x49a   : > { %2568 = vtanh.f32 %v1504_v56  ;;  %v1539_v56 = vunpack.c.h.bf16 %v3514_v23 }
 0x49b   : > { %2570 = vpow2.f32 %v2330_v57 }
 0x4a2   : > { %v2565_v16 = vpop.eup %2564 }
 0x4a3   : > { %v1517_v59 = vadd.f32 1.0, %v2565_v16  ;;  %v2567_v48 = vpop.eup %2566 }
 0x4a4   : > { %v1518_v60 = vadd.f32 1.0, %v2567_v48  ;;  %v2569_v17 = vpop.eup %2568 }
 0x4a5   : > { %2572 = vrcp.f32 %v1517_v59  ;;  %v2571_v61 = vpop.eup %2570 }
 0x4a6   : > { %2574 = vrcp.f32 %v1518_v60  ;;  %v1519_v8 = vadd.f32 1.0, %v2571_v61 }
 0x4a8   : > { %2576 = vrcp.f32 %v1519_v8 }
 0x4af   : > { %v2573_v11 = vpop.eup %2572 }
 0x4b0   : > { %v1528_v12 = vmul.f32 %v2573_v11, %v2569_v17  ;;  %v2575_v54 = vpop.eup %2574 }
 0x4b1   : > { %v1527_v9 = vmul.f32 %v2575_v54, %v3628_v6  ;;  %v1538_v6 = vunpack.c.l.bf16 %v3514_v23 }
 0x4b2   : > { %v2577_v18 = vpop.eup %2576 }
 0x4b3   : > { %v3670_v13 = vadd.f32 %v1528_v12, %v1527_v9 }
 0x4b5   : > { %2578 = vtanh.f32 %v3670_v13 }
 0x4bf   : > { %v2579_v20 = vpop.eup %2578 }
 0x4c0   : > { %v1531_v19 = vmul.f32 %v2579_v20, %v2577_v18 }
 0x4c2   : > { %v1532_v21 = vpack.c.bf16 %v1531_v19, %v1531_v19 }
 0x4c4   : > { %1534 = vst [vmem:[#allocation2 + $0xc] sm:$0xf] %v1532_v21  ;;  %1575 = vmatmul.mubr.bf16.vlgmr.msra.gmra.mrb[32].mxu0 %v1532_v21  ;;  %1616 = vmatmul.mubr.bf16.vlgmr.msra.gmra.mrb[32].mxu1 %v1532_v21 }
 0x4c5   : > { %1659 = vmatpush1.bf16.msra.mxu0 %v3268_v31  ;;  %1700 = vmatpush1.bf16.msra.mxu1 %v3272_v32 }
 0x4c6   : > { %1660 = vmatprep.subr.bf16.mxu0 %v3278_v33  ;;  %1701 = vmatprep.subr.bf16.mxu1 %v3282_v34 }
 0x4c7   : > { %1690 = vmatprep.mubr.bf16.mxu0 %v3920_v1  ;;  %1731 = vmatprep.mubr.bf16.mxu1 %v3920_v1 }
 0x4c9   : > { %1661 = vmatpush1.bf16.msra.mxu0 %v3288_v35  ;;  %1702 = vmatpush1.bf16.msra.mxu1 %v3292_v36 }
 0x4ca   : > { %1662 = vmatprep.subr.bf16.mxu0 %v3298_v37  ;;  %1703 = vmatprep.subr.bf16.mxu1 %v3302_v38 }
 0x4cd   : > { %1663 = vmatpush1.bf16.msra.mxu0 %v3310_v40  ;;  %1704 = vmatpush1.bf16.msra.mxu1 %v3314_v41 }
 0x4ce   : > { %1664 = vmatprep.subr.bf16.mxu0 %v3320_v42  ;;  %1705 = vmatprep.subr.bf16.mxu1 %v3324_v43 }
 0x4d1   : > { %1665 = vmatpush1.bf16.msra.mxu0 %v3330_v44  ;;  %1706 = vmatpush1.bf16.msra.mxu1 %v3334_v45 }
 0x4d2   : > { %1666 = vmatprep.subr.bf16.mxu0 %v3340_v46  ;;  %1707 = vmatprep.subr.bf16.mxu1 %v3344_v47 }
 0x4d5   : > { %1667 = vmatpush1.bf16.msra.mxu0 %v3352_v49  ;;  %1708 = vmatpush1.bf16.msra.mxu1 %v3356_v50 }
 0x4d6   : > { %1668 = vmatprep.subr.bf16.mxu0 %v3362_v51  ;;  %1709 = vmatprep.subr.bf16.mxu1 %v3366_v0 }
 0x4d9   : > { %1669 = vmatpush1.bf16.msra.mxu0 %v3372_v52  ;;  %1710 = vmatpush1.bf16.msra.mxu1 %v3376_v53 }
 0x4da   : > { %1670 = vmatprep.subr.bf16.mxu0 %v3382_v55  ;;  %1711 = vmatprep.subr.bf16.mxu1 %v3386_v4 }
 0x4dd   : > { %1671 = vmatpush1.bf16.msra.mxu0 %v3394_v58  ;;  %1712 = vmatpush1.bf16.msra.mxu1 %v3398_v5 }
 0x4de   : > { %1672 = vmatprep.subr.bf16.mxu0 %v3404_v7  ;;  %1713 = vmatprep.subr.bf16.mxu1 %v3408_v10 }
 0x4e1   : > { %1673 = vmatpush1.bf16.msra.mxu0 %v3414_v62  ;;  %1714 = vmatpush1.bf16.msra.mxu1 %v3418_v63 }
 0x4e2   : > { %1774 = vmatprep.subr.bf16.mxu0 %v3260_v28  ;;  %1815 = vmatprep.subr.bf16.mxu1 %v3264_v29 }
 0x597   : > { %v1576_v27 = vpop.f32.mrb[32].mxu0  ;;  %v1617_v2 = vpop.f32.mrb[32].mxu1 }
 0x598   : > { %v1577_v30 = vadd.f32 %v1576_v27, %v1538_v6  ;;  %v1618_v39 = vadd.f32 %v1617_v2, %v1540_v22  ;;  %v1578_v3 = vpop.f32.mrb[33].mxu0  ;;  %v1619_v14 = vpop.f32.mrb[33].mxu1 }
 0x599   : > { %v1579_v15 = vadd.f32 %v1578_v3, %v1539_v56  ;;  %v1620_v57 = vadd.f32 %v1619_v14, %v1541_v26  ;;  %v1580_v16 = vpop.f32.mrb[34].mxu0  ;;  %v1621_v59 = vpop.f32.mrb[34].mxu1 }
 0x59a   : > { %v2331_v48 = vmul.f32 -1.442695, %v1577_v30  ;;  %v1581_v60 = vpop.f32.mrb[35].mxu0  ;;  %v1622_v17 = vpop.f32.mrb[35].mxu1  ;;  %v2333_v11 = vmul.f32 -1.442695, %v1618_v39 }
 0x59b   : > { %v2332_v61 = vmul.f32 -1.442695, %v1579_v15  ;;  %v3922_v39 = vld [vmem:[#allocation13_spill] sm:$0xff] }
 0x59c   : > { %2580 = vpow2.f32 %v2331_v48  ;;  %v1656_v3 = vunpack.c.l.bf16 %v3922_v39  ;;  %v1657_v16 = vunpack.c.h.bf16 %v3922_v39 }
 0x59d   : > { %2582 = vpow2.f32 %v2332_v61 }
 0x59e   : > { %2584 = vtanh.f32 %v1620_v57 }
 0x59f   : > { %2586 = vpow2.f32 %v2333_v11 }
 0x5a6   : > { %v2581_v12 = vpop.eup %2580 }
 0x5a7   : > { %v1633_v54 = vadd.f32 1.0, %v2581_v12  ;;  %v2583_v23 = vpop.eup %2582 }
 0x5a8   : > { %v1634_v25 = vadd.f32 1.0, %v2583_v23  ;;  %v2585_v8 = vpop.eup %2584 }
 0x5a9   : > { %2588 = vrcp.f32 %v1633_v54  ;;  %v2587_v9 = vpop.eup %2586 }
 0x5aa   : > { %2590 = vrcp.f32 %v1634_v25  ;;  %v1635_v21 = vadd.f32 1.0, %v2587_v9 }
 0x5ac   : > { %2592 = vrcp.f32 %v1635_v21 }
 0x5b3   : > { %v2589_v18 = vpop.eup %2588 }
 0x5b4   : > { %v1644_v20 = vmul.f32 %v2589_v18, %v2585_v8  ;;  %v2591_v19 = vpop.eup %2590 }
 0x5b5   : > { %v1643_v6 = vmul.f32 %v2591_v19, %v3670_v13  ;;  %v3921_v13 = vld [vmem:[#allocation14_spill] sm:$0xff] }
 0x5b6   : > { %v2593_v27 = vpop.eup %2592  ;;  %v1654_v30 = vunpack.c.l.bf16 %v3921_v13  ;;  %v1655_v57 = vunpack.c.h.bf16 %v3921_v13 }
 0x5b7   : > { %v3712_v22 = vadd.f32 %v1644_v20, %v1643_v6 }
 0x5b9   : > { %2594 = vtanh.f32 %v3712_v22 }
 0x5c3   : > { %v2595_v2 = vpop.eup %2594 }
 0x5c4   : > { %v1647_v56 = vmul.f32 %v2595_v2, %v2593_v27 }
 0x5c6   : > { %v1648_v26 = vpack.c.bf16 %v1647_v56, %v1647_v56 }
 0x5c8   : > { %1650 = vst [vmem:[#allocation2 + $0x10] sm:$0xf] %v1648_v26  ;;  %1691 = vmatmul.mubr.bf16.vlgmr.msra.gmra.mrb[36].mxu0 %v1648_v26  ;;  %1732 = vmatmul.mubr.bf16.vlgmr.msra.gmra.mrb[36].mxu1 %v1648_v26 }
 0x5c9   : > { %1775 = vmatpush1.bf16.msra.mxu0 %v3268_v31  ;;  %1816 = vmatpush1.bf16.msra.mxu1 %v3272_v32 }
 0x5ca   : > { %1776 = vmatprep.subr.bf16.mxu0 %v3278_v33  ;;  %1817 = vmatprep.subr.bf16.mxu1 %v3282_v34 }
 0x5cb   : > { %1806 = vmatprep.mubr.bf16.mxu0 %v3920_v1  ;;  %1847 = vmatprep.mubr.bf16.mxu1 %v3920_v1 }
 0x5cd   : > { %1777 = vmatpush1.bf16.msra.mxu0 %v3288_v35  ;;  %1818 = vmatpush1.bf16.msra.mxu1 %v3292_v36 }
 0x5ce   : > { %1778 = vmatprep.subr.bf16.mxu0 %v3298_v37  ;;  %1819 = vmatprep.subr.bf16.mxu1 %v3302_v38 }
 0x5d1   : > { %1779 = vmatpush1.bf16.msra.mxu0 %v3310_v40  ;;  %1820 = vmatpush1.bf16.msra.mxu1 %v3314_v41 }
 0x5d2   : > { %1780 = vmatprep.subr.bf16.mxu0 %v3320_v42  ;;  %1821 = vmatprep.subr.bf16.mxu1 %v3324_v43 }
 0x5d5   : > { %1781 = vmatpush1.bf16.msra.mxu0 %v3330_v44  ;;  %1822 = vmatpush1.bf16.msra.mxu1 %v3334_v45 }
 0x5d6   : > { %1782 = vmatprep.subr.bf16.mxu0 %v3340_v46  ;;  %1823 = vmatprep.subr.bf16.mxu1 %v3344_v47 }
 0x5d9   : > { %1783 = vmatpush1.bf16.msra.mxu0 %v3352_v49  ;;  %1824 = vmatpush1.bf16.msra.mxu1 %v3356_v50 }
 0x5da   : > { %1784 = vmatprep.subr.bf16.mxu0 %v3362_v51  ;;  %1825 = vmatprep.subr.bf16.mxu1 %v3366_v0 }
 0x5dd   : > { %1785 = vmatpush1.bf16.msra.mxu0 %v3372_v52  ;;  %1826 = vmatpush1.bf16.msra.mxu1 %v3376_v53 }
 0x5de   : > { %1786 = vmatprep.subr.bf16.mxu0 %v3382_v55  ;;  %1827 = vmatprep.subr.bf16.mxu1 %v3386_v4 }
 0x5e1   : > { %1787 = vmatpush1.bf16.msra.mxu0 %v3394_v58  ;;  %1828 = vmatpush1.bf16.msra.mxu1 %v3398_v5 }
 0x5e2   : > { %1788 = vmatprep.subr.bf16.mxu0 %v3404_v7  ;;  %1829 = vmatprep.subr.bf16.mxu1 %v3408_v10 }
 0x5e5   : > { %1789 = vmatpush1.bf16.msra.mxu0 %v3414_v62  ;;  %1830 = vmatpush1.bf16.msra.mxu1 %v3418_v63 }
 0x5e6   : > { %1890 = vmatprep.subr.bf16.mxu0 %v3260_v28  ;;  %1931 = vmatprep.subr.bf16.mxu1 %v3264_v29 }
 0x69b   : > { %v1692_v14 = vpop.f32.mrb[36].mxu0  ;;  %v1733_v15 = vpop.f32.mrb[36].mxu1 }
 0x69c   : > { %v1693_v59 = vadd.f32 %v1692_v14, %v1654_v30  ;;  %v1734_v48 = vadd.f32 %v1733_v15, %v1656_v3  ;;  %v1694_v60 = vpop.f32.mrb[37].mxu0  ;;  %v1735_v17 = vpop.f32.mrb[37].mxu1 }
 0x69d   : > { %v1695_v61 = vadd.f32 %v1694_v60, %v1655_v57  ;;  %v1736_v11 = vadd.f32 %v1735_v17, %v1657_v16  ;;  %v1696_v12 = vpop.f32.mrb[38].mxu0  ;;  %v1737_v28 = vpop.f32.mrb[38].mxu1  ;;  %v3925_v17 = vld [vmem:[#allocation17_spill] sm:$0xff] }
 0x69e   : > { %v2334_v54 = vmul.f32 -1.442695, %v1693_v59  ;;  %v1697_v29 = vpop.f32.mrb[39].mxu0  ;;  %v1738_v23 = vpop.f32.mrb[39].mxu1  ;;  %v2336_v8 = vmul.f32 -1.442695, %v1734_v48 }
 0x69f   : > { %v2335_v25 = vmul.f32 -1.442695, %v1695_v61  ;;  %v3924_v48 = vld [vmem:[#allocation16_spill] sm:$0xff]  ;;  %v1888_v61 = vunpack.c.l.bf16 %v3925_v17 }
 0x6a0   : > { %2596 = vpow2.f32 %v2334_v54  ;;  %v1886_v60 = vunpack.c.l.bf16 %v3924_v48  ;;  %v1887_v28 = vunpack.c.h.bf16 %v3924_v48  ;;  %v1889_v54 = vunpack.c.h.bf16 %v3925_v17 }
 0x6a1   : > { %2598 = vpow2.f32 %v2335_v25 }
 0x6a2   : > { %2600 = vtanh.f32 %v1736_v11 }
 0x6a3   : > { %2602 = vpow2.f32 %v2336_v8 }
 0x6aa   : > { %v2597_v9 = vpop.eup %2596 }
 0x6ab   : > { %v1749_v18 = vadd.f32 1.0, %v2597_v9  ;;  %v2599_v20 = vpop.eup %2598 }
 0x6ac   : > { %v1750_v19 = vadd.f32 1.0, %v2599_v20  ;;  %v2601_v21 = vpop.eup %2600 }
 0x6ad   : > { %2604 = vrcp.f32 %v1749_v18  ;;  %v2603_v6 = vpop.eup %2602 }
 0x6ae   : > { %2606 = vrcp.f32 %v1750_v19  ;;  %v1751_v26 = vadd.f32 1.0, %v2603_v6 }
 0x6b0   : > { %2608 = vrcp.f32 %v1751_v26 }
 0x6b7   : > { %v2605_v27 = vpop.eup %2604 }
 0x6b8   : > { %v1760_v2 = vmul.f32 %v2605_v27, %v2601_v21  ;;  %v2607_v56 = vpop.eup %2606 }
 0x6b9   : > { %v1759_v13 = vmul.f32 %v2607_v56, %v3712_v22 }
 0x6ba   : > { %v2609_v39 = vpop.eup %2608 }
 0x6bb   : > { %v3754_v30 = vadd.f32 %v1760_v2, %v1759_v13 }
 0x6bd   : > { %2610 = vtanh.f32 %v3754_v30 }
 0x6c7   : > { %v2611_v3 = vpop.eup %2610 }
 0x6c8   : > { %v1763_v14 = vmul.f32 %v2611_v3, %v2609_v39 }
 0x6ca   : > { %v1764_v15 = vpack.c.bf16 %v1763_v14, %v1763_v14 }
 0x6cc   : > { %1766 = vst [vmem:[#allocation2 + $0x14] sm:$0xf] %v1764_v15  ;;  %1807 = vmatmul.mubr.bf16.vlgmr.msra.gmra.mrb[40].mxu0 %v1764_v15  ;;  %1848 = vmatmul.mubr.bf16.vlgmr.msra.gmra.mrb[40].mxu1 %v1764_v15 }
 0x6cd   : > { %1891 = vmatpush1.bf16.msra.mxu0 %v3268_v31  ;;  %1932 = vmatpush1.bf16.msra.mxu1 %v3272_v32  ;;  %v1770_v31 = vunpack.c.l.bf16 %v3530_v24  ;;  %v3923_v32 = vld [vmem:[#allocation15_spill] sm:$0xff] }
 0x6ce   : > { %1892 = vmatprep.subr.bf16.mxu0 %v3278_v33  ;;  %1933 = vmatprep.subr.bf16.mxu1 %v3282_v34  ;;  %v1772_v33 = vunpack.c.l.bf16 %v3923_v32 }
 0x6cf   : > { %1922 = vmatprep.mubr.bf16.mxu0 %v3920_v1  ;;  %1963 = vmatprep.mubr.bf16.mxu1 %v3920_v1 }
 0x6d1   : > { %1893 = vmatpush1.bf16.msra.mxu0 %v3288_v35  ;;  %1934 = vmatpush1.bf16.msra.mxu1 %v3292_v36  ;;  %v1771_v36 = vunpack.c.h.bf16 %v3530_v24 }
 0x6d2   : > { %1894 = vmatprep.subr.bf16.mxu0 %v3298_v37  ;;  %1935 = vmatprep.subr.bf16.mxu1 %v3302_v38  ;;  %v1773_v37 = vunpack.c.h.bf16 %v3923_v32 }
 0x6d5   : > { %1895 = vmatpush1.bf16.msra.mxu0 %v3310_v40  ;;  %1936 = vmatpush1.bf16.msra.mxu1 %v3314_v41 }
 0x6d6   : > { %1896 = vmatprep.subr.bf16.mxu0 %v3320_v42  ;;  %1937 = vmatprep.subr.bf16.mxu1 %v3324_v43 }
 0x6d9   : > { %1897 = vmatpush1.bf16.msra.mxu0 %v3330_v44  ;;  %1938 = vmatpush1.bf16.msra.mxu1 %v3334_v45 }
 0x6da   : > { %1898 = vmatprep.subr.bf16.mxu0 %v3340_v46  ;;  %1939 = vmatprep.subr.bf16.mxu1 %v3344_v47 }
 0x6dd   : > { %1899 = vmatpush1.bf16.msra.mxu0 %v3352_v49  ;;  %1940 = vmatpush1.bf16.msra.mxu1 %v3356_v50 }
 0x6de   : > { %1900 = vmatprep.subr.bf16.mxu0 %v3362_v51  ;;  %1941 = vmatprep.subr.bf16.mxu1 %v3366_v0 }
 0x6e1   : > { %1901 = vmatpush1.bf16.msra.mxu0 %v3372_v52  ;;  %1942 = vmatpush1.bf16.msra.mxu1 %v3376_v53 }
 0x6e2   : > { %1902 = vmatprep.subr.bf16.mxu0 %v3382_v55  ;;  %1943 = vmatprep.subr.bf16.mxu1 %v3386_v4 }
 0x6e5   : > { %1903 = vmatpush1.bf16.msra.mxu0 %v3394_v58  ;;  %1944 = vmatpush1.bf16.msra.mxu1 %v3398_v5 }
 0x6e6   : > { %1904 = vmatprep.subr.bf16.mxu0 %v3404_v7  ;;  %1945 = vmatprep.subr.bf16.mxu1 %v3408_v10 }
 0x6e9   : > { %1905 = vmatpush1.bf16.msra.mxu0 %v3414_v62  ;;  %1946 = vmatpush1.bf16.msra.mxu1 %v3418_v63 }
 0x79f   : > { %v1808_v34 = vpop.f32.mrb[40].mxu0  ;;  %v1849_v35 = vpop.f32.mrb[40].mxu1 }
 0x7a0   : > { %v1809_v38 = vadd.f32 %v1808_v34, %v1770_v31  ;;  %v1850_v40 = vadd.f32 %v1849_v35, %v1772_v33  ;;  %v1810_v41 = vpop.f32.mrb[41].mxu0  ;;  %v1851_v42 = vpop.f32.mrb[41].mxu1 }
 0x7a1   : > { %v1811_v43 = vadd.f32 %v1810_v41, %v1771_v36  ;;  %v1852_v44 = vadd.f32 %v1851_v42, %v1773_v37  ;;  %v1812_v45 = vpop.f32.mrb[42].mxu0  ;;  %v1853_v46 = vpop.f32.mrb[42].mxu1  ;;  %v2004_v41 = vld [vmem:[%s3875_s4] sm:$0xff] (!%p2343_p8)  ;;  %v2005_v42 = vld [vmem:[%s3875_s4 + $0x8] sm:$0xff] (!%p2343_p8) }
 0x7a2   : > { %v2337_v47 = vmul.f32 -1.442695, %v1809_v38  ;;  %v1813_v49 = vpop.f32.mrb[43].mxu0  ;;  %v1854_v50 = vpop.f32.mrb[43].mxu1  ;;  %v2339_v0 = vmul.f32 -1.442695, %v1850_v40  ;;  %v2420_v45 = vpack.c.bf16 (!%p2343_p8), %v2005_v42, %v2004_v41 }
 0x7a3   : > { %v2338_v51 = vmul.f32 -1.442695, %v1811_v43  ;;  %v2006_v43 = vld [vmem:[%s3875_s4 + $0x10] sm:$0xff] (!%p2343_p8)  ;;  %v2007_v46 = vld [vmem:[%s3875_s4 + $0x18] sm:$0xff] (!%p2343_p8)  ;;  %v2008_v50 = vld [vmem:[%s3875_s4 + $0x20] sm:$0xff] (!%p2343_p8) }
 0x7a4   : > { %2612 = vpow2.f32 %v2337_v47  ;;  %v2771_v47 = vmov (!%p2343_p8), 0.0   ;;  %v2423_v49 = vpack.c.bf16 (!%p2343_p8), %v2007_v46, %v2006_v43 }
 0x7a5   : > { %2614 = vpow2.f32 %v2338_v51  ;;  %v2009_v51 = vld [vmem:[%s3875_s4 + $0x28] sm:$0xff] (!%p2343_p8) }
 0x7a6   : > { %2616 = vtanh.f32 %v1852_v44  ;;  %v2769_v44 = vmov (!%p2343_p8), 0.0|0.0  }
 0x7a7   : > { %2618 = vpow2.f32 %v2339_v0  ;;  %2419 = vmatprep.subr.bf16.mxu0 (!%p2343_p8), %v2769_v44  ;;  %v2426_v0 = vpack.c.bf16 (!%p2343_p8), %v2009_v51, %v2008_v50 }
 0x7ae   : > { %v2613_v52 = vpop.eup %2612 }
 0x7af   : > { %v1865_v53 = vadd.f32 1.0, %v2613_v52  ;;  %v2615_v55 = vpop.eup %2614  ;;  %v2010_v52 = vld [vmem:[%s3875_s4 + $0x30] sm:$0xff] (!%p2343_p8) }
 0x7b0   : > { %v1866_v4 = vadd.f32 1.0, %v2615_v55  ;;  %v2617_v58 = vpop.eup %2616 }
 0x7b1   : > { %2620 = vrcp.f32 %v1865_v53  ;;  %v2619_v5 = vpop.eup %2618  ;;  %v2011_v53 = vld [vmem:[%s3875_s4 + $0x38] sm:$0xff] (!%p2343_p8) }
 0x7b2   : > { %2622 = vrcp.f32 %v1866_v4  ;;  %v1867_v63 = vadd.f32 1.0, %v2619_v5  ;;  %v2429_v55 = vpack.c.bf16 (!%p2343_p8), %v2011_v53, %v2010_v52  ;;  %v2012_v4 = vld [vmem:[%s3875_s4 + $0x40] sm:$0xff] (!%p2343_p8) }
 0x7b4   : > { %2624 = vrcp.f32 %v1867_v63  ;;  %v2016_v63 = vld [vmem:[%s3875_s4 + $0x60] sm:$0xff] (!%p2343_p8) }
 0x7bb   : > { %v2621_v7 = vpop.eup %2620 }
 0x7bc   : > { %v1876_v10 = vmul.f32 %v2621_v7, %v2617_v58  ;;  %v2623_v62 = vpop.eup %2622  ;;  %v2013_v58 = vld [vmem:[%s3875_s4 + $0x48] sm:$0xff] (!%p2343_p8)  ;;  %v2014_v7 = vld [vmem:[%s3875_s4 + $0x50] sm:$0xff] (!%p2343_p8) }
 0x7bd   : > { %v1875_v24 = vmul.f32 %v2623_v62, %v3754_v30  ;;  %v2432_v5 = vpack.c.bf16 (!%p2343_p8), %v2013_v58, %v2012_v4 }
 0x7be   : > { %v2625_v22 = vpop.eup %2624 }
 0x7bf   : > { %v1877_v1 = vadd.f32 %v1876_v10, %v1875_v24  ;;  %v2015_v10 = vld [vmem:[%s3875_s4 + $0x58] sm:$0xff] (!%p2343_p8)  ;;  %v2017_v24 = vld [vmem:[%s3875_s4 + $0x68] sm:$0xff] (!%p2343_p8) }
 0x7c0   : > { %v2435_v62 = vpack.c.bf16 (!%p2343_p8), %v2015_v10, %v2014_v7 }
 0x7c1   : > { %2626 = vtanh.f32 %v1877_v1 }
 0x7cb   : > { %v2627_v57 = vpop.eup %2626 }
 0x7cc   : > { %v1879_v16 = vmul.f32 %v2627_v57, %v2625_v22  ;;  %v2018_v22 = vld [vmem:[%s3875_s4 + $0x70] sm:$0xff] (!%p2343_p8)  ;;  %v2019_v57 = vld [vmem:[%s3875_s4 + $0x78] sm:$0xff] (!%p2343_p8) }
 0x7ce   : > { %v1880_v59 = vpack.c.bf16 %v1879_v16, %v1879_v16  ;;  %v2441_v16 = vpack.c.bf16 (!%p2343_p8), %v2019_v57, %v2018_v22 }
 0x7d0   : > { %1882 = vst [vmem:[#allocation2 + $0x18] sm:$0xf] %v1880_v59  ;;  %1923 = vmatmul.mubr.bf16.vlgmr.msra.gmra.mrb[44].mxu0 %v1880_v59  ;;  %1964 = vmatmul.mubr.bf16.vlgmr.msra.gmra.mrb[44].mxu1 %v1880_v59  ;;  %v2344_v59 = vld [vmem:[%s3876_s5] ss:$0 sm:$0xff] (!%p2343_p8) }
 0x7d1   : > { %2416 = vmatprep.mubr.msk.f32.mxu0 (!%p2343_p8), %vm2770_vm0, %v2771_v47  ;;  %2421 = vmatpush3.bf16.msra.mxu0 (!%p2343_p8), %v2420_v45 }
 0x7d2   : > { %2422 = vmatprep.subr.bf16.mxu0 (!%p2343_p8), %v2769_v44 }
 0x7d5   : > { %2424 = vmatpush3.bf16.msra.mxu0 (!%p2343_p8), %v2423_v49 }
 0x7d6   : > { %2425 = vmatprep.subr.bf16.mxu0 (!%p2343_p8), %v2769_v44 }
 0x7d9   : > { %2427 = vmatpush3.bf16.msra.mxu0 (!%p2343_p8), %v2426_v0 }
 0x7da   : > { %2428 = vmatprep.subr.bf16.mxu0 (!%p2343_p8), %v2769_v44 }
 0x7dd   : > { %2430 = vmatpush3.bf16.msra.mxu0 (!%p2343_p8), %v2429_v55 }
 0x7de   : > { %2431 = vmatprep.subr.bf16.mxu0 (!%p2343_p8), %v2769_v44 }
 0x7e1   : > { %2433 = vmatpush3.bf16.msra.mxu0 (!%p2343_p8), %v2432_v5 }
 0x7e2   : > { %2434 = vmatprep.subr.bf16.mxu0 (!%p2343_p8), %v2769_v44 }
 0x7e5   : > { %2436 = vmatpush3.bf16.msra.mxu0 (!%p2343_p8), %v2435_v62 }
 0x7e6   : > { %2437 = vmatprep.subr.bf16.mxu0 (!%p2343_p8), %v2769_v44 }
 0x8a3   : > { %v1924_v11 = vpop.f32.mrb[44].mxu0  ;;  %v1965_v12 = vpop.f32.mrb[44].mxu1 }
 0x8a4   : > { %v1925_v29 = vadd.f32 %v1924_v11, %v1886_v60  ;;  %v1966_v23 = vadd.f32 %v1965_v12, %v1888_v61  ;;  %v1926_v25 = vpop.f32.mrb[45].mxu0  ;;  %v1967_v8 = vpop.f32.mrb[45].mxu1 }
 0x8a5   : > { %v1927_v9 = vadd.f32 %v1926_v25, %v1887_v28  ;;  %v1968_v18 = vadd.f32 %v1967_v8, %v1889_v54  ;;  %v1928_v20 = vpop.f32.mrb[46].mxu0  ;;  %v1969_v19 = vpop.f32.mrb[46].mxu1 }
 0x8a6   : > { %v2340_v21 = vmul.f32 -1.442695, %v1925_v29  ;;  %v1929_v6 = vpop.f32.mrb[47].mxu0  ;;  %v1970_v27 = vpop.f32.mrb[47].mxu1  ;;  %v2342_v56 = vmul.f32 -1.442695, %v1966_v23 }
 0x8a7   : > { %v2341_v2 = vmul.f32 -1.442695, %v1927_v9 }
 0x8a8   : > { %2628 = vpow2.f32 %v2340_v21 }
 0x8a9   : > { %2630 = vpow2.f32 %v2341_v2 }
 0x8aa   : > { %2632 = vtanh.f32 %v1968_v18 }
 0x8ab   : > { %2634 = vpow2.f32 %v2342_v56 }
 0x8b2   : > { %v2629_v26 = vpop.eup %2628 }
 0x8b3   : > { %v1981_v13 = vadd.f32 1.0, %v2629_v26  ;;  %v2631_v30 = vpop.eup %2630 }
 0x8b4   : > { %v1982_v39 = vadd.f32 1.0, %v2631_v30  ;;  %v2633_v3 = vpop.eup %2632 }
 0x8b5   : > { %2636 = vrcp.f32 %v1981_v13  ;;  %v2635_v14 = vpop.eup %2634 }
 0x8b6   : > { %2638 = vrcp.f32 %v1982_v39  ;;  %v1983_v33 = vadd.f32 1.0, %v2635_v14 }
 0x8b8   : > { %2640 = vrcp.f32 %v1983_v33 }
 0x8bf   : > { %v2637_v15 = vpop.eup %2636 }
 0x8c0   : > { %v1992_v31 = vmul.f32 %v2637_v15, %v2633_v3  ;;  %v2639_v32 = vpop.eup %2638 }
 0x8c1   : > { %v1991_v34 = vmul.f32 %v2639_v32, %v1877_v1  ;;  %v2438_v1 = vpack.c.bf16 (!%p2343_p8), %v2017_v24, %v2016_v63 }
 0x8c2   : > { %v2641_v36 = vpop.eup %2640 }
 0x8c3   : > { %v1993_v35 = vadd.f32 %v1992_v31, %v1991_v34  ;;  %2439 = vmatpush3.bf16.msra.mxu0 (!%p2343_p8), %v2438_v1 }
 0x8c4   : > { %2440 = vmatprep.subr.bf16.mxu0 (!%p2343_p8), %v2769_v44 }
 0x8c5   : > { %2642 = vtanh.f32 %v1993_v35 }
 0x8c7   : > { %2442 = vmatpush3.bf16.msra.mxu0 (!%p2343_p8), %v2441_v16 }
 0x8ce   : > { %2002 = sbr.rel (%p2343_p8) target bundleno = 2473 (0x9a9), region = 94 }
 0x8cf   : > { %v2643_v37 = vpop.eup %2642 }
 0x8d0   : > { %v1995_v38 = vmul.f32 %v2643_v37, %v2641_v36 }
 0x8d2   : > { %v1996_v40 = vpack.c.bf16 %v1995_v38, %v1995_v38  ;;  %2417 = vmatmul.mubr.f32.vlgmr.msra.gmra.mrb[0].mxu0 (!%p2343_p8), %v1995_v38 }
 0x8d4   : > { %1998 = vst [vmem:[#allocation2 + $0x1c] sm:$0xf] %v1996_v40 }
 0x9a5   : > { %v2093_v48 = vpop.f32.mrb[0].mxu0 }
 0x9a6   : > { %v2094_v60 = vadd.f32 %v2344_v59, %v2093_v48  ;;  %v2418_v17 = vpop.f32.mrb[1].mxu0 }
 0x9a8   : > { %2098 = vst.msk [vmem:[%s3877_s6] sm:$0xff] %vm2097_vm1, %v2094_v60 }
 0x9a9 PF: > { %s22_s26 = sadd.s32 1, %s2762_s26   ;;  %s3926_s21 = smov %s2746_s22 }
 0x9aa   : > { %p19_p1 = scmp.ge.s32.totalorder %s22_s26, 4   ;;  %s3927_s22 = smov %s2750_s23 }
 0x9ab   : > { %s3928_s23 = smov %s2856_s9  ;;  %s3929_s24 = smov %s2758_s25 }
 0x9ac   : > { %s3930_s25 = smov %s3932_s28  ;;  %21 = sbr.rel (!%p19_p1) target bundleno = 6 (0x6), region = 165 }
 0x9b3   :  { %2118 = vsyncpa [#allocation6], 1 }
 0x9b4   :  { %2120 = vsyncpa [#allocation6 + $0x1], 1 }
 0x9b5   :  { %2121 = vsyncpa [#allocation8], 1 }
 0x9b6   :  { %2123 = vsyncpa [#allocation8 + $0x1], 1 }
 0x9b7   :  { %2124 = vsyncmov [#allocation4] }
 0x9ba   :  { %s2125_s30 = vpop.sfrf %2124 }
 0x9bb   :  { %p2348_p2 = scmp.ne.s32.totalorder %s2125_s30, 0 }
 0x9bd   :  { %2129 = shalt.err (%p2348_p2)  }

</bundles_post_ra>
